<compile_context>
chip_gen: v5e
topology: v5e:2x2
jax: 0.10.0
libtpu: 0.0.40
codegen_flags: <defaults>
</compile_context>

<pallas_src>
import functools

import jax
import jax.numpy as jnp
from jax import lax
from jax.experimental import pallas as pl
from jax.experimental.pallas import tpu as pltpu


def _resblock_kernel(x_ref, xt_ref, xb_ref, w1_ref, b1_ref, w2_ref, b2_ref,
                     o_ref, xs_ref, mid_ref, *, TH, W, Cp, res_scale):
    """One (batch, row-tile) step of the fused residual block.

    x_ref  : (1, TH, W+2, Cp)   f32 width-padded input tile (rows r0..r0+TH-1)
    xt_ref : (1, 2, W+2, Cp)    f32 rows [r0-2, r0-1]     (clamped; masked if first tile)
    xb_ref : (1, 2, W+2, Cp)    f32 rows [r0+TH, r0+TH+1] (clamped; masked if last tile)
    w*_ref : (3, 3*Cp, Cp)      bf16 per-dy fused weights, k = dx*Cp + cin
    b*_ref : (1, Cp)            f32 bias
    o_ref  : (1, TH, W, Cp)     f32 output tile
    xs_ref : (TH+4, W+2, Cp)    bf16 scratch: halo'd, width-padded input tile
    mid_ref: (TH+2, W+2, Cp)    bf16 scratch: zero-bordered conv1 activations
    """
    i = pl.program_id(1)
    last = pl.num_programs(1) - 1
    Wp = W + 2
    f32 = jnp.float32
    bf16 = jnp.bfloat16

    # ---- stage halo'd input tile (bf16, whole-slab stores only) -------------
    xs_ref[2:TH + 2] = x_ref[0].astype(bf16)

    @pl.when(i == 0)
    def _():
        xs_ref[0:2] = jnp.zeros((2, Wp, Cp), bf16)

    @pl.when(i > 0)
    def _():
        xs_ref[0:2] = xt_ref[0].astype(bf16)

    @pl.when(i == last)
    def _():
        xs_ref[TH + 2:TH + 4] = jnp.zeros((2, Wp, Cp), bf16)

    @pl.when(i < last)
    def _():
        xs_ref[TH + 2:TH + 4] = xb_ref[0].astype(bf16)

    def conv3x3(src_ref, w_ref, rows):
        """3x3 'same' conv over src_ref[0:rows+2] -> (rows*W, Cp) f32 accumulator."""
        acc = jnp.zeros((rows * W, Cp), f32)
        for dy in range(3):
            # Fuse the 3 dx taps along channels -> one fat (rows*W, 3Cp) bf16 operand.
            cat = jnp.concatenate(
                [src_ref[dy:dy + rows, 0:W, :],
                 src_ref[dy:dy + rows, 1:W + 1, :],
                 src_ref[dy:dy + rows, 2:W + 2, :]], axis=-1)   # (rows, W, 3Cp) bf16
            acc += jnp.dot(cat.reshape(rows * W, 3 * Cp), w_ref[dy],
                           preferred_element_type=f32)
        return acc

    # ---- conv1 + bias + ReLU over TH+2 rows (tile rows + 1-row halo) --------
    m = jnp.maximum(conv3x3(xs_ref, w1_ref, TH + 2) + b1_ref[...], 0.0)
    m = m.reshape(TH + 2, W, Cp).astype(bf16)
    zcol = jnp.zeros((TH + 2, 1, Cp), bf16)
    mid_ref[...] = jnp.concatenate([zcol, m, zcol], axis=1)   # zero 1-px width border

    # conv1 halo rows that fall outside the image are conv2 zero-padding.
    @pl.when(i == 0)
    def _():
        mid_ref[0:1] = jnp.zeros((1, Wp, Cp), bf16)

    @pl.when(i == last)
    def _():
        mid_ref[TH + 1:TH + 2] = jnp.zeros((1, Wp, Cp), bf16)

    # ---- conv2 + bias, residual add (all f32, identity stays exact) ---------
    out = conv3x3(mid_ref, w2_ref, TH) + b2_ref[...]
    ident = x_ref[0, :, 1:W + 1, :]                    # f32 image columns
    o_ref[0] = (ident + res_scale * out.reshape(TH, W, Cp)).astype(o_ref.dtype)


def _pack_weights(w, C, Cp):
    """(9, Cin, Cout) tap-major (t = dy*3+dx) -> (3, 3*Cp, Cp) bf16, k = dx*Cp + cin."""
    w = jnp.asarray(w, jnp.float32).reshape(3, 3, C, C)
    wp = jnp.zeros((3, 3, Cp, Cp), jnp.float32).at[:, :, :C, :C].set(w)
    return wp.reshape(3, 3 * Cp, Cp).astype(jnp.bfloat16)


def _pick_tile_rows(H, W, Cp, acc_budget_bytes=1 << 20):
    """Largest even divisor of H whose f32 conv1 accumulator fits the budget."""
    if H % 2 == 1:
        return H
    cands = [th for th in range(2, H + 1, 2) if H % th == 0]
    fits = [th for th in cands if (th + 2) * W * Cp * 4 <= acc_budget_bytes]
    return max(fits) if fits else min(cands)


def residual_block_no_bn(x_nchw, w1, b1, w2, b2, *, res_scale=1.0, tile_rows=None):
    """x_nchw: (N, C, H, W). w*: (9, C, C) tap-major. b*: (C,). Returns (N, C, H, W)."""
    N, C, H, W = x_nchw.shape
    Cp = ((C + 127) // 128) * 128          # lane-dense channel count
    Wp = W + 2                             # 1-px zero border baked in on the host

    if tile_rows is None:
        tile_rows = _pick_tile_rows(H, W, Cp)
    TH = int(tile_rows)
    assert H % TH == 0 and (TH % 2 == 0 or TH == H), \
        "tile_rows must divide H and be even (unless it equals H)"
    nH = H // TH

    # NCHW -> NHWC with lane-dense channels + 1-px width zero border.
    # TODO(synk): for NHWC end-to-end pipelines with C % 128 == 0 these
    # transpose/pad boundary ops disappear entirely (and several residual
    # blocks could be chained inside one pallas_call).
    x = jnp.transpose(x_nchw, (0, 2, 3, 1)).astype(jnp.float32)
    x = jnp.pad(x, ((0, 0), (0, 0), (1, 1), (0, Cp - C)))

    w1p = _pack_weights(w1, C, Cp)
    w2p = _pack_weights(w2, C, Cp)
    b1p = jnp.zeros((1, Cp), jnp.float32).at[0, :C].set(jnp.asarray(b1, jnp.float32))
    b2p = jnp.zeros((1, Cp), jnp.float32).at[0, :C].set(jnp.asarray(b2, jnp.float32))

    kernel = functools.partial(_resblock_kernel, TH=TH, W=W, Cp=Cp,
                               res_scale=float(res_scale))

    th2 = TH // 2              # halo inputs are tiled in 2-row blocks along H
    hmax2 = (H - 1) // 2       # last valid 2-row block index

    out = pl.pallas_call(
        kernel,
        out_shape=jax.ShapeDtypeStruct((N, H, W, Cp), jnp.float32),
        grid_spec=pltpu.PrefetchScalarGridSpec(
            num_scalar_prefetch=0,
            grid=(N, nH),
            in_specs=[
                pl.BlockSpec((1, TH, Wp, Cp), lambda n, i: (n, i, 0, 0)),
                pl.BlockSpec((1, 2, Wp, Cp),
                             lambda n, i: (n, jnp.maximum(i * th2 - 1, 0), 0, 0)),
                pl.BlockSpec((1, 2, Wp, Cp),
                             lambda n, i: (n, jnp.minimum((i + 1) * th2, hmax2), 0, 0)),
                pl.BlockSpec((3, 3 * Cp, Cp), lambda n, i: (0, 0, 0)),
                pl.BlockSpec((1, Cp), lambda n, i: (0, 0)),
                pl.BlockSpec((3, 3 * Cp, Cp), lambda n, i: (0, 0, 0)),
                pl.BlockSpec((1, Cp), lambda n, i: (0, 0)),
            ],
            out_specs=pl.BlockSpec((1, TH, W, Cp), lambda n, i: (n, i, 0, 0)),
            scratch_shapes=[
                pltpu.VMEM((TH + 4, Wp, Cp), jnp.bfloat16),   # halo'd input tile
                pltpu.VMEM((TH + 2, Wp, Cp), jnp.bfloat16),   # conv1 activations
            ],
        ),
        compiler_params=pltpu.CompilerParams(
            dimension_semantics=("parallel", "parallel"),
            vmem_limit_bytes=32 * 1024 * 1024),
    )(x, x, x, w1p, b1p, w2p, b2p)

    out = out[..., :C]
    return jnp.transpose(out, (0, 3, 1, 2))


def _reference(x_nchw, w1, b1, w2, b2, res_scale):
    """Pure-JAX reference using lax.conv (NCHW, same semantics as nn.Conv2d)."""
    C = x_nchw.shape[1]

    def to_oihw(w):
        return jnp.transpose(w.reshape(3, 3, C, C), (3, 2, 0, 1))

    dn = lax.conv_dimension_numbers(x_nchw.shape, (C, C, 3, 3),
                                    ("NCHW", "OIHW", "NCHW"))

    def conv(x, w, b):
        y = lax.conv_general_dilated(x, to_oihw(w), (1, 1), "SAME",
                                     dimension_numbers=dn)
        return y + b.reshape(1, C, 1, 1)

    out = conv(jnp.maximum(conv(x_nchw, w1, b1), 0.0), w2, b2)
    return x_nchw + res_scale * out


if __name__ == "__main__":
    key = jax.random.PRNGKey(0)
    N, C, H, W = 2, 4, 16, 16
    res_scale = 1.0

    k_x, k_w1, k_w2, k_b1, k_b2 = jax.random.split(key, 5)
    x = jax.random.normal(k_x, (N, C, H, W), jnp.float32)

    # Kaiming-normal-like init scaled by 0.1 (as in default_init_weights); use
    # non-zero biases so the out-of-image halo masking is actually exercised.
    fan_in = C * 3 * 3
    std = (2.0 / fan_in) ** 0.5
    w1 = jax.random.normal(k_w1, (9, C, C), jnp.float32) * std * 0.1
    w2 = jax.random.normal(k_w2, (9, C, C), jnp.float32) * std * 0.1
    b1 = jax.random.normal(k_b1, (C,), jnp.float32) * 0.05
    b2 = jax.random.normal(k_b2, (C,), jnp.float32) * 0.05

    ref = _reference(x, w1, b1, w2, b2, res_scale)

    # Multi-row-tile path (exercises first / middle / last tile halo logic).
    out = residual_block_no_bn(x, w1, b1, w2, b2, res_scale=res_scale, tile_rows=4)
    out = jax.block_until_ready(out)
    assert out.shape == (N, C, H, W)
    assert jnp.allclose(out, ref, atol=5e-3, rtol=5e-3), "mismatch (tiled) vs reference"

    # Auto-selected tile size (single tile for this small image).
    out2 = residual_block_no_bn(x, w1, b1, w2, b2, res_scale=res_scale)
    out2 = jax.block_until_ready(out2)
    assert jnp.allclose(out2, ref, atol=5e-3, rtol=5e-3), "mismatch (auto) vs reference"

    print("KERNEL_OK")
</pallas_src>

<mosaic_0001>
module attributes {stable_mosaic.version = 11 : i64} {
  func.func @_resblock_kernel(%arg0: i32, %arg1: i32, %arg2: memref<1x4x18x128xf32, #tpu.memory_space<vmem>>, %arg3: memref<1x2x18x128xf32, #tpu.memory_space<vmem>>, %arg4: memref<1x2x18x128xf32, #tpu.memory_space<vmem>>, %arg5: memref<3x384x128xbf16, #tpu.memory_space<vmem>>, %arg6: memref<1x128xf32, #tpu.memory_space<vmem>>, %arg7: memref<3x384x128xbf16, #tpu.memory_space<vmem>>, %arg8: memref<1x128xf32, #tpu.memory_space<vmem>>, %arg9: memref<1x4x16x128xf32, #tpu.memory_space<vmem>>, %arg10: memref<8x18x128xbf16, #tpu.memory_space<vmem>>, %arg11: memref<6x18x128xbf16, #tpu.memory_space<vmem>>) attributes {dimension_semantics = [#tpu.dimension_semantics<parallel>, #tpu.dimension_semantics<parallel>], iteration_bounds = array<i64: 2, 4>, scalar_prefetch = 0 : i64, scratch_operands = 2 : i64, tpu.core_type = #tpu.core_type<tc>, window_params = [{transform_indices = @transform_0, window_bounds = array<i64: 1, 4, 18, 128>}, {transform_indices = @transform_1, window_bounds = array<i64: 1, 2, 18, 128>}, {transform_indices = @transform_2, window_bounds = array<i64: 1, 2, 18, 128>}, {pipeline_mode = #tpu.pipeline_mode<synchronous>, transform_indices = @transform_3, window_bounds = array<i64: 3, 384, 128>}, {pipeline_mode = #tpu.pipeline_mode<synchronous>, transform_indices = @transform_4, window_bounds = array<i64: 1, 128>}, {pipeline_mode = #tpu.pipeline_mode<synchronous>, transform_indices = @transform_5, window_bounds = array<i64: 3, 384, 128>}, {pipeline_mode = #tpu.pipeline_mode<synchronous>, transform_indices = @transform_6, window_bounds = array<i64: 1, 128>}, {transform_indices = @transform_7, window_bounds = array<i64: 1, 4, 16, 128>}]} {
    %c0 = arith.constant 0 : index
    %c0_0 = arith.constant 0 : index
    %c0_1 = arith.constant 0 : index
    %c0_2 = arith.constant 0 : index
    %0 = vector.load %arg2[%c0, %c0_0, %c0_1, %c0_2] : memref<1x4x18x128xf32, #tpu.memory_space<vmem>>, vector<1x4x18x128xf32>
    %1 = vector.shape_cast %0 : vector<1x4x18x128xf32> to vector<4x18x128xf32>
    %2 = arith.truncf %1 : vector<4x18x128xf32> to vector<4x18x128xbf16>
    %c2 = arith.constant 2 : index
    %c0_3 = arith.constant 0 : index
    %c0_4 = arith.constant 0 : index
    %3 = vector.load %arg10[%c2, %c0_3, %c0_4] : memref<8x18x128xbf16, #tpu.memory_space<vmem>>, vector<4x18x128xbf16>
    tpu.vector_store %arg10[%c2, %c0_3, %c0_4], %2 {strides = array<i32>} : memref<8x18x128xbf16, #tpu.memory_space<vmem>>, vector<4x18x128xbf16>,
    %c0_i32 = arith.constant 0 : i32
    %4 = arith.cmpi eq, %arg1, %c0_i32 : i32
    %5 = arith.extui %4 : i1 to i32
    %c0_i32_5 = arith.constant 0 : i32
    %6 = arith.cmpi ne, %5, %c0_i32_5 : i32
    scf.if %6 {
      %cst_111 = arith.constant 0.000000e+00 : bf16
      %100 = vector.broadcast %cst_111 : bf16 to vector<2x18x128xbf16>
      %c0_112 = arith.constant 0 : index
      %c0_113 = arith.constant 0 : index
      %c0_114 = arith.constant 0 : index
      %101 = vector.load %arg10[%c0_112, %c0_113, %c0_114] : memref<8x18x128xbf16, #tpu.memory_space<vmem>>, vector<2x18x128xbf16>
      tpu.vector_store %arg10[%c0_112, %c0_113, %c0_114], %100 {strides = array<i32>} : memref<8x18x128xbf16, #tpu.memory_space<vmem>>, vector<2x18x128xbf16>,
    } else {
    }
    %c0_i32_6 = arith.constant 0 : i32
    %7 = arith.cmpi sgt, %arg1, %c0_i32_6 : i32
    %8 = arith.extui %7 : i1 to i32
    %c0_i32_7 = arith.constant 0 : i32
    %9 = arith.cmpi ne, %8, %c0_i32_7 : i32
    scf.if %9 {
      %c0_111 = arith.constant 0 : index
      %c0_112 = arith.constant 0 : index
      %c0_113 = arith.constant 0 : index
      %c0_114 = arith.constant 0 : index
      %100 = vector.load %arg3[%c0_111, %c0_112, %c0_113, %c0_114] : memref<1x2x18x128xf32, #tpu.memory_space<vmem>>, vector<1x2x18x128xf32>
      %101 = vector.shape_cast %100 : vector<1x2x18x128xf32> to vector<2x18x128xf32>
      %102 = arith.truncf %101 : vector<2x18x128xf32> to vector<2x18x128xbf16>
      %c0_115 = arith.constant 0 : index
      %c0_116 = arith.constant 0 : index
      %c0_117 = arith.constant 0 : index
      %103 = vector.load %arg10[%c0_115, %c0_116, %c0_117] : memref<8x18x128xbf16, #tpu.memory_space<vmem>>, vector<2x18x128xbf16>
      tpu.vector_store %arg10[%c0_115, %c0_116, %c0_117], %102 {strides = array<i32>} : memref<8x18x128xbf16, #tpu.memory_space<vmem>>, vector<2x18x128xbf16>,
    } else {
    }
    %c3_i32 = arith.constant 3 : i32
    %10 = arith.cmpi eq, %arg1, %c3_i32 : i32
    %11 = arith.extui %10 : i1 to i32
    %c0_i32_8 = arith.constant 0 : i32
    %12 = arith.cmpi ne, %11, %c0_i32_8 : i32
    scf.if %12 {
      %cst_111 = arith.constant 0.000000e+00 : bf16
      %100 = vector.broadcast %cst_111 : bf16 to vector<2x18x128xbf16>
      %c6 = arith.constant 6 : index
      %c0_112 = arith.constant 0 : index
      %c0_113 = arith.constant 0 : index
      %101 = vector.load %arg10[%c6, %c0_112, %c0_113] : memref<8x18x128xbf16, #tpu.memory_space<vmem>>, vector<2x18x128xbf16>
      tpu.vector_store %arg10[%c6, %c0_112, %c0_113], %100 {strides = array<i32>} : memref<8x18x128xbf16, #tpu.memory_space<vmem>>, vector<2x18x128xbf16>,
    } else {
    }
    %c3_i32_9 = arith.constant 3 : i32
    %13 = arith.cmpi slt, %arg1, %c3_i32_9 : i32
    %14 = arith.extui %13 : i1 to i32
    %c0_i32_10 = arith.constant 0 : i32
    %15 = arith.cmpi ne, %14, %c0_i32_10 : i32
    scf.if %15 {
      %c0_111 = arith.constant 0 : index
      %c0_112 = arith.constant 0 : index
      %c0_113 = arith.constant 0 : index
      %c0_114 = arith.constant 0 : index
      %100 = vector.load %arg4[%c0_111, %c0_112, %c0_113, %c0_114] : memref<1x2x18x128xf32, #tpu.memory_space<vmem>>, vector<1x2x18x128xf32>
      %101 = vector.shape_cast %100 : vector<1x2x18x128xf32> to vector<2x18x128xf32>
      %102 = arith.truncf %101 : vector<2x18x128xf32> to vector<2x18x128xbf16>
      %c6 = arith.constant 6 : index
      %c0_115 = arith.constant 0 : index
      %c0_116 = arith.constant 0 : index
      %103 = vector.load %arg10[%c6, %c0_115, %c0_116] : memref<8x18x128xbf16, #tpu.memory_space<vmem>>, vector<2x18x128xbf16>
      tpu.vector_store %arg10[%c6, %c0_115, %c0_116], %102 {strides = array<i32>} : memref<8x18x128xbf16, #tpu.memory_space<vmem>>, vector<2x18x128xbf16>,
    } else {
    }
    %cst = arith.constant 0.000000e+00 : f32
    %16 = vector.broadcast %cst : f32 to vector<96x128xf32>
    %c0_11 = arith.constant 0 : index
    %c0_12 = arith.constant 0 : index
    %c0_13 = arith.constant 0 : index
    %17 = vector.load %arg10[%c0_11, %c0_12, %c0_13] : memref<8x18x128xbf16, #tpu.memory_space<vmem>>, vector<6x16x128xbf16>
    %c0_14 = arith.constant 0 : index
    %c1 = arith.constant 1 : index
    %c0_15 = arith.constant 0 : index
    %18 = vector.load %arg10[%c0_14, %c1, %c0_15] : memref<8x18x128xbf16, #tpu.memory_space<vmem>>, vector<6x16x128xbf16>
    %c0_16 = arith.constant 0 : index
    %c2_17 = arith.constant 2 : index
    %c0_18 = arith.constant 0 : index
    %19 = vector.load %arg10[%c0_16, %c2_17, %c0_18] : memref<8x18x128xbf16, #tpu.memory_space<vmem>>, vector<6x16x128xbf16>
    %20 = tpu.concatenate %17, %18, %19 in 2 : vector<6x16x128xbf16>, vector<6x16x128xbf16>, vector<6x16x128xbf16> -> vector<6x16x384xbf16>
    %21 = vector.shape_cast %20 : vector<6x16x384xbf16> to vector<96x384xbf16>
    %c0_19 = arith.constant 0 : index
    %c0_20 = arith.constant 0 : index
    %c0_21 = arith.constant 0 : index
    %22 = vector.load %arg5[%c0_19, %c0_20, %c0_21] : memref<3x384x128xbf16, #tpu.memory_space<vmem>>, vector<1x384x128xbf16>
    %23 = vector.shape_cast %22 : vector<1x384x128xbf16> to vector<384x128xbf16>
    %cst_22 = arith.constant dense<0.000000e+00> : vector<96x128xf32>
    %24 = tpu.matmul %21, %23, %cst_22 {dimension_numbers = #tpu.dot_dimension_numbers<[1], [0], [0], [1], [0, 0, 1, 1], [], []>} : vector<96x384xbf16>, vector<384x128xbf16>, vector<96x128xf32> -> vector<96x128xf32>
    %25 = arith.addf %16, %24 : vector<96x128xf32>
    %c1_23 = arith.constant 1 : index
    %c0_24 = arith.constant 0 : index
    %c0_25 = arith.constant 0 : index
    %26 = vector.load %arg10[%c1_23, %c0_24, %c0_25] : memref<8x18x128xbf16, #tpu.memory_space<vmem>>, vector<6x16x128xbf16>
    %c1_26 = arith.constant 1 : index
    %c1_27 = arith.constant 1 : index
    %c0_28 = arith.constant 0 : index
    %27 = vector.load %arg10[%c1_26, %c1_27, %c0_28] : memref<8x18x128xbf16, #tpu.memory_space<vmem>>, vector<6x16x128xbf16>
    %c1_29 = arith.constant 1 : index
    %c2_30 = arith.constant 2 : index
    %c0_31 = arith.constant 0 : index
    %28 = vector.load %arg10[%c1_29, %c2_30, %c0_31] : memref<8x18x128xbf16, #tpu.memory_space<vmem>>, vector<6x16x128xbf16>
    %29 = tpu.concatenate %26, %27, %28 in 2 : vector<6x16x128xbf16>, vector<6x16x128xbf16>, vector<6x16x128xbf16> -> vector<6x16x384xbf16>
    %30 = vector.shape_cast %29 : vector<6x16x384xbf16> to vector<96x384xbf16>
    %c1_32 = arith.constant 1 : index
    %c0_33 = arith.constant 0 : index
    %c0_34 = arith.constant 0 : index
    %31 = vector.load %arg5[%c1_32, %c0_33, %c0_34] : memref<3x384x128xbf16, #tpu.memory_space<vmem>>, vector<1x384x128xbf16>
    %32 = vector.shape_cast %31 : vector<1x384x128xbf16> to vector<384x128xbf16>
    %cst_35 = arith.constant dense<0.000000e+00> : vector<96x128xf32>
    %33 = tpu.matmul %30, %32, %cst_35 {dimension_numbers = #tpu.dot_dimension_numbers<[1], [0], [0], [1], [0, 0, 1, 1], [], []>} : vector<96x384xbf16>, vector<384x128xbf16>, vector<96x128xf32> -> vector<96x128xf32>
    %34 = arith.addf %25, %33 : vector<96x128xf32>
    %c2_36 = arith.constant 2 : index
    %c0_37 = arith.constant 0 : index
    %c0_38 = arith.constant 0 : index
    %35 = vector.load %arg10[%c2_36, %c0_37, %c0_38] : memref<8x18x128xbf16, #tpu.memory_space<vmem>>, vector<6x16x128xbf16>
    %c2_39 = arith.constant 2 : index
    %c1_40 = arith.constant 1 : index
    %c0_41 = arith.constant 0 : index
    %36 = vector.load %arg10[%c2_39, %c1_40, %c0_41] : memref<8x18x128xbf16, #tpu.memory_space<vmem>>, vector<6x16x128xbf16>
    %c2_42 = arith.constant 2 : index
    %c2_43 = arith.constant 2 : index
    %c0_44 = arith.constant 0 : index
    %37 = vector.load %arg10[%c2_42, %c2_43, %c0_44] : memref<8x18x128xbf16, #tpu.memory_space<vmem>>, vector<6x16x128xbf16>
    %38 = tpu.concatenate %35, %36, %37 in 2 : vector<6x16x128xbf16>, vector<6x16x128xbf16>, vector<6x16x128xbf16> -> vector<6x16x384xbf16>
    %39 = vector.shape_cast %38 : vector<6x16x384xbf16> to vector<96x384xbf16>
    %c2_45 = arith.constant 2 : index
    %c0_46 = arith.constant 0 : index
    %c0_47 = arith.constant 0 : index
    %40 = vector.load %arg5[%c2_45, %c0_46, %c0_47] : memref<3x384x128xbf16, #tpu.memory_space<vmem>>, vector<1x384x128xbf16>
    %41 = vector.shape_cast %40 : vector<1x384x128xbf16> to vector<384x128xbf16>
    %cst_48 = arith.constant dense<0.000000e+00> : vector<96x128xf32>
    %42 = tpu.matmul %39, %41, %cst_48 {dimension_numbers = #tpu.dot_dimension_numbers<[1], [0], [0], [1], [0, 0, 1, 1], [], []>} : vector<96x384xbf16>, vector<384x128xbf16>, vector<96x128xf32> -> vector<96x128xf32>
    %43 = arith.addf %34, %42 : vector<96x128xf32>
    %c0_49 = arith.constant 0 : index
    %c0_50 = arith.constant 0 : index
    %44 = vector.load %arg6[%c0_49, %c0_50] : memref<1x128xf32, #tpu.memory_space<vmem>>, vector<1x128xf32>
    %45 = vector.broadcast %44 : vector<1x128xf32> to vector<96x128xf32>
    %46 = arith.addf %43, %45 : vector<96x128xf32>
    %cst_51 = arith.constant 0.000000e+00 : f32
    %47 = vector.broadcast %cst_51 : f32 to vector<96x128xf32>
    %48 = arith.maximumf %46, %47 : vector<96x128xf32>
    %49 = vector.shape_cast %48 : vector<96x128xf32> to vector<6x16x128xf32>
    %50 = arith.truncf %49 : vector<6x16x128xf32> to vector<6x16x128xbf16>
    %cst_52 = arith.constant 0.000000e+00 : bf16
    %51 = vector.broadcast %cst_52 : bf16 to vector<6x1x128xbf16>
    %52 = tpu.concatenate %51, %50, %51 in 1 : vector<6x1x128xbf16>, vector<6x16x128xbf16>, vector<6x1x128xbf16> -> vector<6x18x128xbf16>
    %c0_53 = arith.constant 0 : index
    %c0_54 = arith.constant 0 : index
    %c0_55 = arith.constant 0 : index
    %53 = vector.load %arg11[%c0_53, %c0_54, %c0_55] : memref<6x18x128xbf16, #tpu.memory_space<vmem>>, vector<6x18x128xbf16>
    tpu.vector_store %arg11[%c0_53, %c0_54, %c0_55], %52 {strides = array<i32>} : memref<6x18x128xbf16, #tpu.memory_space<vmem>>, vector<6x18x128xbf16>,
    %c0_i32_56 = arith.constant 0 : i32
    %54 = arith.cmpi eq, %arg1, %c0_i32_56 : i32
    %55 = arith.extui %54 : i1 to i32
    %c0_i32_57 = arith.constant 0 : i32
    %56 = arith.cmpi ne, %55, %c0_i32_57 : i32
    scf.if %56 {
      %cst_111 = arith.constant 0.000000e+00 : bf16
      %100 = vector.broadcast %cst_111 : bf16 to vector<1x18x128xbf16>
      %c0_112 = arith.constant 0 : index
      %c0_113 = arith.constant 0 : index
      %c0_114 = arith.constant 0 : index
      %101 = vector.load %arg11[%c0_112, %c0_113, %c0_114] : memref<6x18x128xbf16, #tpu.memory_space<vmem>>, vector<1x18x128xbf16>
      tpu.vector_store %arg11[%c0_112, %c0_113, %c0_114], %100 {strides = array<i32>} : memref<6x18x128xbf16, #tpu.memory_space<vmem>>, vector<1x18x128xbf16>,
    } else {
    }
    %c3_i32_58 = arith.constant 3 : i32
    %57 = arith.cmpi eq, %arg1, %c3_i32_58 : i32
    %58 = arith.extui %57 : i1 to i32
    %c0_i32_59 = arith.constant 0 : i32
    %59 = arith.cmpi ne, %58, %c0_i32_59 : i32
    scf.if %59 {
      %cst_111 = arith.constant 0.000000e+00 : bf16
      %100 = vector.broadcast %cst_111 : bf16 to vector<1x18x128xbf16>
      %c5 = arith.constant 5 : index
      %c0_112 = arith.constant 0 : index
      %c0_113 = arith.constant 0 : index
      %101 = vector.load %arg11[%c5, %c0_112, %c0_113] : memref<6x18x128xbf16, #tpu.memory_space<vmem>>, vector<1x18x128xbf16>
      tpu.vector_store %arg11[%c5, %c0_112, %c0_113], %100 {strides = array<i32>} : memref<6x18x128xbf16, #tpu.memory_space<vmem>>, vector<1x18x128xbf16>,
    } else {
    }
    %cst_60 = arith.constant 0.000000e+00 : f32
    %60 = vector.broadcast %cst_60 : f32 to vector<64x128xf32>
    %c0_61 = arith.constant 0 : index
    %c0_62 = arith.constant 0 : index
    %c0_63 = arith.constant 0 : index
    %61 = vector.load %arg11[%c0_61, %c0_62, %c0_63] : memref<6x18x128xbf16, #tpu.memory_space<vmem>>, vector<4x16x128xbf16>
    %c0_64 = arith.constant 0 : index
    %c1_65 = arith.constant 1 : index
    %c0_66 = arith.constant 0 : index
    %62 = vector.load %arg11[%c0_64, %c1_65, %c0_66] : memref<6x18x128xbf16, #tpu.memory_space<vmem>>, vector<4x16x128xbf16>
    %c0_67 = arith.constant 0 : index
    %c2_68 = arith.constant 2 : index
    %c0_69 = arith.constant 0 : index
    %63 = vector.load %arg11[%c0_67, %c2_68, %c0_69] : memref<6x18x128xbf16, #tpu.memory_space<vmem>>, vector<4x16x128xbf16>
    %64 = tpu.concatenate %61, %62, %63 in 2 : vector<4x16x128xbf16>, vector<4x16x128xbf16>, vector<4x16x128xbf16> -> vector<4x16x384xbf16>
    %65 = vector.shape_cast %64 : vector<4x16x384xbf16> to vector<64x384xbf16>
    %c0_70 = arith.constant 0 : index
    %c0_71 = arith.constant 0 : index
    %c0_72 = arith.constant 0 : index
    %66 = vector.load %arg7[%c0_70, %c0_71, %c0_72] : memref<3x384x128xbf16, #tpu.memory_space<vmem>>, vector<1x384x128xbf16>
    %67 = vector.shape_cast %66 : vector<1x384x128xbf16> to vector<384x128xbf16>
    %cst_73 = arith.constant dense<0.000000e+00> : vector<64x128xf32>
    %68 = tpu.matmul %65, %67, %cst_73 {dimension_numbers = #tpu.dot_dimension_numbers<[1], [0], [0], [1], [0, 0, 1, 1], [], []>} : vector<64x384xbf16>, vector<384x128xbf16>, vector<64x128xf32> -> vector<64x128xf32>
    %69 = arith.addf %60, %68 : vector<64x128xf32>
    %c1_74 = arith.constant 1 : index
    %c0_75 = arith.constant 0 : index
    %c0_76 = arith.constant 0 : index
    %70 = vector.load %arg11[%c1_74, %c0_75, %c0_76] : memref<6x18x128xbf16, #tpu.memory_space<vmem>>, vector<4x16x128xbf16>
    %c1_77 = arith.constant 1 : index
    %c1_78 = arith.constant 1 : index
    %c0_79 = arith.constant 0 : index
    %71 = vector.load %arg11[%c1_77, %c1_78, %c0_79] : memref<6x18x128xbf16, #tpu.memory_space<vmem>>, vector<4x16x128xbf16>
    %c1_80 = arith.constant 1 : index
    %c2_81 = arith.constant 2 : index
    %c0_82 = arith.constant 0 : index
    %72 = vector.load %arg11[%c1_80, %c2_81, %c0_82] : memref<6x18x128xbf16, #tpu.memory_space<vmem>>, vector<4x16x128xbf16>
    %73 = tpu.concatenate %70, %71, %72 in 2 : vector<4x16x128xbf16>, vector<4x16x128xbf16>, vector<4x16x128xbf16> -> vector<4x16x384xbf16>
    %74 = vector.shape_cast %73 : vector<4x16x384xbf16> to vector<64x384xbf16>
    %c1_83 = arith.constant 1 : index
    %c0_84 = arith.constant 0 : index
    %c0_85 = arith.constant 0 : index
    %75 = vector.load %arg7[%c1_83, %c0_84, %c0_85] : memref<3x384x128xbf16, #tpu.memory_space<vmem>>, vector<1x384x128xbf16>
    %76 = vector.shape_cast %75 : vector<1x384x128xbf16> to vector<384x128xbf16>
    %cst_86 = arith.constant dense<0.000000e+00> : vector<64x128xf32>
    %77 = tpu.matmul %74, %76, %cst_86 {dimension_numbers = #tpu.dot_dimension_numbers<[1], [0], [0], [1], [0, 0, 1, 1], [], []>} : vector<64x384xbf16>, vector<384x128xbf16>, vector<64x128xf32> -> vector<64x128xf32>
    %78 = arith.addf %69, %77 : vector<64x128xf32>
    %c2_87 = arith.constant 2 : index
    %c0_88 = arith.constant 0 : index
    %c0_89 = arith.constant 0 : index
    %79 = vector.load %arg11[%c2_87, %c0_88, %c0_89] : memref<6x18x128xbf16, #tpu.memory_space<vmem>>, vector<4x16x128xbf16>
    %c2_90 = arith.constant 2 : index
    %c1_91 = arith.constant 1 : index
    %c0_92 = arith.constant 0 : index
    %80 = vector.load %arg11[%c2_90, %c1_91, %c0_92] : memref<6x18x128xbf16, #tpu.memory_space<vmem>>, vector<4x16x128xbf16>
    %c2_93 = arith.constant 2 : index
    %c2_94 = arith.constant 2 : index
    %c0_95 = arith.constant 0 : index
    %81 = vector.load %arg11[%c2_93, %c2_94, %c0_95] : memref<6x18x128xbf16, #tpu.memory_space<vmem>>, vector<4x16x128xbf16>
    %82 = tpu.concatenate %79, %80, %81 in 2 : vector<4x16x128xbf16>, vector<4x16x128xbf16>, vector<4x16x128xbf16> -> vector<4x16x384xbf16>
    %83 = vector.shape_cast %82 : vector<4x16x384xbf16> to vector<64x384xbf16>
    %c2_96 = arith.constant 2 : index
    %c0_97 = arith.constant 0 : index
    %c0_98 = arith.constant 0 : index
    %84 = vector.load %arg7[%c2_96, %c0_97, %c0_98] : memref<3x384x128xbf16, #tpu.memory_space<vmem>>, vector<1x384x128xbf16>
    %85 = vector.shape_cast %84 : vector<1x384x128xbf16> to vector<384x128xbf16>
    %cst_99 = arith.constant dense<0.000000e+00> : vector<64x128xf32>
    %86 = tpu.matmul %83, %85, %cst_99 {dimension_numbers = #tpu.dot_dimension_numbers<[1], [0], [0], [1], [0, 0, 1, 1], [], []>} : vector<64x384xbf16>, vector<384x128xbf16>, vector<64x128xf32> -> vector<64x128xf32>
    %87 = arith.addf %78, %86 : vector<64x128xf32>
    %c0_100 = arith.constant 0 : index
    %c0_101 = arith.constant 0 : index
    %88 = vector.load %arg8[%c0_100, %c0_101] : memref<1x128xf32, #tpu.memory_space<vmem>>, vector<1x128xf32>
    %89 = vector.broadcast %88 : vector<1x128xf32> to vector<64x128xf32>
    %90 = arith.addf %87, %89 : vector<64x128xf32>
    %c0_102 = arith.constant 0 : index
    %c0_103 = arith.constant 0 : index
    %c1_104 = arith.constant 1 : index
    %c0_105 = arith.constant 0 : index
    %91 = vector.load %arg2[%c0_102, %c0_103, %c1_104, %c0_105] : memref<1x4x18x128xf32, #tpu.memory_space<vmem>>, vector<1x4x16x128xf32>
    %92 = vector.shape_cast %91 : vector<1x4x16x128xf32> to vector<4x16x128xf32>
    %93 = vector.shape_cast %90 : vector<64x128xf32> to vector<4x16x128xf32>
    %cst_106 = arith.constant 1.000000e+00 : f32
    %94 = vector.broadcast %cst_106 : f32 to vector<4x16x128xf32>
    %95 = arith.mulf %94, %93 : vector<4x16x128xf32>
    %96 = arith.addf %92, %95 : vector<4x16x128xf32>
    %c0_107 = arith.constant 0 : index
    %c0_108 = arith.constant 0 : index
    %c0_109 = arith.constant 0 : index
    %c0_110 = arith.constant 0 : index
    %97 = vector.load %arg9[%c0_107, %c0_108, %c0_109, %c0_110] : memref<1x4x16x128xf32, #tpu.memory_space<vmem>>, vector<1x4x16x128xf32>
    %98 = vector.shape_cast %97 : vector<1x4x16x128xf32> to vector<4x16x128xf32>
    %99 = vector.shape_cast %96 : vector<4x16x128xf32> to vector<1x4x16x128xf32>
    tpu.vector_store %arg9[%c0_107, %c0_108, %c0_109, %c0_110], %99 {strides = array<i32>} : memref<1x4x16x128xf32, #tpu.memory_space<vmem>>, vector<1x4x16x128xf32>,
    return
  }
  func.func @transform_0(%arg0: i32, %arg1: i32) -> (i32, i32, i32, i32) {
    %c0_i32 = arith.constant 0 : i32
    %c0_i32_0 = arith.constant 0 : i32
    %c0_i32_1 = arith.constant 0 : i32
    return %arg0, %arg1, %c0_i32, %c0_i32_0 : i32, i32, i32, i32
  }
  func.func @transform_1(%arg0: i32, %arg1: i32) -> (i32, i32, i32, i32) {
    %c2_i32 = arith.constant 2 : i32
    %0 = arith.muli %arg1, %c2_i32 : i32
    %c1_i32 = arith.constant 1 : i32
    %1 = arith.subi %0, %c1_i32 : i32
    %c0_i32 = arith.constant 0 : i32
    %2 = arith.maxsi %1, %c0_i32 : i32
    %c0_i32_0 = arith.constant 0 : i32
    %c0_i32_1 = arith.constant 0 : i32
    %c0_i32_2 = arith.constant 0 : i32
    return %arg0, %2, %c0_i32_0, %c0_i32_1 : i32, i32, i32, i32
  }
  func.func @transform_2(%arg0: i32, %arg1: i32) -> (i32, i32, i32, i32) {
    %c1_i32 = arith.constant 1 : i32
    %0 = arith.addi %arg1, %c1_i32 : i32
    %c2_i32 = arith.constant 2 : i32
    %1 = arith.muli %0, %c2_i32 : i32
    %c7_i32 = arith.constant 7 : i32
    %2 = arith.minsi %1, %c7_i32 : i32
    %c0_i32 = arith.constant 0 : i32
    %c0_i32_0 = arith.constant 0 : i32
    %c0_i32_1 = arith.constant 0 : i32
    return %arg0, %2, %c0_i32, %c0_i32_0 : i32, i32, i32, i32
  }
  func.func @transform_3(%arg0: i32, %arg1: i32) -> (i32, i32, i32) {
    %c0_i32 = arith.constant 0 : i32
    %c0_i32_0 = arith.constant 0 : i32
    %c0_i32_1 = arith.constant 0 : i32
    %c0_i32_2 = arith.constant 0 : i32
    return %c0_i32, %c0_i32_0, %c0_i32_1 : i32, i32, i32
  }
  func.func @transform_4(%arg0: i32, %arg1: i32) -> (i32, i32) {
    %c0_i32 = arith.constant 0 : i32
    %c0_i32_0 = arith.constant 0 : i32
    %c0_i32_1 = arith.constant 0 : i32
    return %c0_i32, %c0_i32_0 : i32, i32
  }
  func.func @transform_5(%arg0: i32, %arg1: i32) -> (i32, i32, i32) {
    %c0_i32 = arith.constant 0 : i32
    %c0_i32_0 = arith.constant 0 : i32
    %c0_i32_1 = arith.constant 0 : i32
    %c0_i32_2 = arith.constant 0 : i32
    return %c0_i32, %c0_i32_0, %c0_i32_1 : i32, i32, i32
  }
  func.func @transform_6(%arg0: i32, %arg1: i32) -> (i32, i32) {
    %c0_i32 = arith.constant 0 : i32
    %c0_i32_0 = arith.constant 0 : i32
    %c0_i32_1 = arith.constant 0 : i32
    return %c0_i32, %c0_i32_0 : i32, i32
  }
  func.func @transform_7(%arg0: i32, %arg1: i32) -> (i32, i32, i32, i32) {
    %c0_i32 = arith.constant 0 : i32
    %c0_i32_0 = arith.constant 0 : i32
    %c0_i32_1 = arith.constant 0 : i32
    return %arg0, %arg1, %c0_i32, %c0_i32_0 : i32, i32, i32, i32
  }
}

</mosaic_0001>

<bundles_post_ra>
// kernel: tpu_custom_call.1
= control target key start
LH: loop header
LB: loop body
LE: loop exit
PB: predicated region body
PF: predicated region fallthrough
CT: control target
= control target key end

     0   :  { %s6171_s0 = inlined_call_operand.vmem [shape: f32[2,16,18,128], index: 0, kind: input, shape index: {}]   ;;  %s6172_s1 = inlined_call_operand.vmem [shape: f32[2,16,18,128], index: 1, kind: input, shape index: {}]   ;;  %s6173_s2 = inlined_call_operand.vmem [shape: f32[2,16,18,128], index: 2, kind: input, shape index: {}]   ;;  %s6174_s3 = inlined_call_operand.vmem [shape: bf16[3,384,128], index: 3, kind: input, shape index: {}]   ;;  %s6175_s4 = inlined_call_operand.vmem [shape: f32[1,128], index: 4, kind: input, shape index: {}]   ;;  %s6176_s5 = inlined_call_operand.vmem [shape: bf16[3,384,128], index: 5, kind: input, shape index: {}]   ;;  %s6177_s6 = inlined_call_operand.vmem [shape: f32[1,128], index: 6, kind: input, shape index: {}]   ;;  %s6178_s7 = inlined_call_operand.hbm [shape: f32[2,16,16,128], index: 7, kind: output, shape index: {}]  }
   0x1   :  { %6184 = sst [smem:[#allocation12_spill]] %s6171_s0 }
   0x2   :  { %12 = vsyncpa [#allocation5], 0 }
   0x3   :  { %14 = vsyncpa [#allocation5 + $0x1], 0  ;;  %s5126_s24 = smov 0   ;;  %s5128_s25 = smov 0  }
   0x4   :  { %s5130_s26 = smov 0   ;;  %s5132_s27 = smov 0  }
   0x5   :  { %s5134_s28 = smov 0   ;;  %s5136_s29 = smov 0  }
   0x6   :  { %s5138_s30 = smov 0   ;;  %s5140_s8 = smov 0  }
   0x7 LB: > { %6185 = sst [smem:[#allocation7_spill]] %s5070_s29  ;;  %s3750_s9 = sadd.s32 4294967295, %s5078_s8   ;;  %s5078_s8 = sphi %s5140_s8, %s20_s8   ;;  %s5074_s30 = sphi %s5138_s30, %s6200_s30   ;;  %s5070_s29 = sphi %s5136_s29, %s6199_s29   ;;  %s5066_s28 = sphi %s5134_s28, %s6198_s28   ;;  %s5062_s27 = sphi %s5132_s27, %s6204_s27   ;;  %s5058_s26 = sphi %s5130_s26, %s6203_s26   ;;  %s5054_s25 = sphi %s5128_s25, %s6202_s25   ;;  %s5050_s24 = sphi %s5126_s24, %s6201_s24  }
   0x8   : > { %6186 = sst [smem:[#allocation8_spill]] %s5074_s30  ;;  %s3751_s10 = sadd.s32 4294967294, %s5078_s8  }
   0x9   : > { %s29_s11 = sadd.s32 1, %s5070_s29  ;;  %s32_s12 = sadd.s32 1, %s5074_s30 }
   0xa   : > { %p30_p0 = scmp.ge.s32.totalorder %s29_s11, 4  ;;  %p235_p1 = scmp.ne.s32.totalorder %s5058_s26, %s5054_s25 }
   0xb   : > { %p236_p2 = scmp.eq.s32.totalorder %s3750_s9, 7  ;;  %p241_p5 = scmp.ne.s32.totalorder %s5054_s25, %s5050_s24 }
   0xc   : > { %s6206_s11 = smov (%p30_p0, %s29_s11), 0  ;;  %s6208_s12 = smov (!%p30_p0, %s32_s12), %s5074_s30 }
   0xd   : > { %6187 = sst [smem:[#allocation9_spill]] %s6206_s11  ;;  %s221_s13 = ssub.s32 %s5070_s29, %s6206_s11 }
   0xe   : > { %p5177_p3 = por %p236_p2, %p235_p1  ;;  %p34_p4 = scmp.ge.s32.totalorder %s6208_s12, 2 }
   0xf   : > { %p242_p6 = scmp.eq.s32.totalorder %s3751_s10, 7  ;;  %p3760_p7 = scmp.ge.s32.totalorder %s5078_s8, 1 }
  0x10   : > { %s6210_s12 = smov (%p34_p4, %s6208_s12), 0  ;;  %p330_p9 = scmp.lt.s32.totalorder %s5078_s8, 9 }
  0x11   : > { %6189 = sst [smem:[#allocation10_spill]] %s6210_s12  ;;  %p5186_p8 = por %p242_p6, %p241_p5 }
  0x12   : > { %s220_s16 = ssub.s32 %s5074_s30, %s6210_s12  ;;  %s225_s17 = sadd.s32 1, %s5058_s26 }
  0x13   : > { %s222_s18 = sor.u32 %s221_s13, %s220_s16  ;;  %p331_p10 = pnand %p3760_p7, %p330_p9 }
  0x14   : > { %p223_p11 = scmp.eq.s32.totalorder %s222_s18, 0  ;;  %s6182_s20 = sand.u32 (!%p331_p10), 1, %s5054_s25  }
  0x15   : > { %334 = sbr.rel (%p331_p10) target bundleno = 923 (0x39b), region = 48  ;;  %s3762_s21 = sshll.u32 (!%p331_p10), %s5062_s27, 2 }
  0x16   : > { %s5195_s19 = scalar_select %p223_p11, %s5058_s26, %s225_s17  }
  0x17   : > { %s5201_s22 = sshll.u32 (!%p331_p10), %s6182_s20, 6  ;;  %p396_p12 = scmp.lt.s32.totalorder (!%p331_p10), %s5066_s28, 1 }
  0x18   : > { %6191 = sst [smem:[#allocation11_spill]] %s5195_s19  ;;  %p398_p13 = scmp.lt.s32.totalorder (!%p331_p10), %s3762_s21, 15 }
  0x19   : > { %s3764_s10 = sshll.u32 (!%p331_p10), %s5062_s27, 1  ;;  %s6192_s0 = sld [smem:[#allocation12_spill]] (!%p331_p10) }
  0x1a   : > { %s397_s23 = scalar_select %p396_p12, %s5066_s28, 1 }
  0x1b   : > { %s6212_s21 = smov (!%p398_p13, %s3762_s21), 15  ;;  %s3765_s16 = sadd.s32 4294967295, %s3764_s10 }
  0x1c   : > { %s5205_s9 = smul.u32 48, %s397_s23  ;;  %p408_p0 = scmp.gt.s32.totalorder %s3765_s16, 0 }
  0x1d   : > { %s4856_s13 = smul.u32 3, %s6212_s21  ;;  %s4557_s17 = sadd.s32 2, %s3764_s10 }
  0x1e   : > { %p427_p1 = scmp.lt.s32.totalorder %s4557_s17, 7  ;;  %s6214_s16 = smov (!%p408_p0, %s3765_s16), 0 }
  0x1f   : > { %s402_s18 = sadd.s32 %s5205_s9, %s4856_s13  ;;  %s3766_s30 = sshll.u32 %s6214_s16, 1 }
  0x20   : > { %s3763_s12 = sshll.u32 %s402_s18, 3  ;;  %s6216_s17 = smov (!%p427_p1, %s4557_s17), 7 }
  0x21   : > { %s5212_s20 = scalar_lea.vmem %s6192_s0, %s3763_s12  ;;  %p413_p2 = scmp.lt.s32.totalorder %s3766_s30, 15 }
  0x22   : > { %v446_v0 = vld [vmem:[%s5212_s20] sm:$0xff]  ;;  %v447_v1 = vld [vmem:[%s5212_s20 + $0x8] sm:$0xff]  ;;  %v448_v2 = vld [vmem:[%s5212_s20 + $0x10] sm:$0x3]  ;;  %s3769_s11 = sshll.u32 %s6216_s17, 1  ;;  %p3771_p5 = scmp.ne.s32.totalorder %s5062_s27, 0 }
  0x23   : > { %v4706_v3 = vpack.c.bf16 %v447_v1, %v446_v0  ;;  %v460_v4 = vpack.c.bf16 %v448_v2, %v448_v2  ;;  %v449_v5 = vld [vmem:[%s5212_s20 + $0x18] sm:$0xff]  ;;  %v450_v6 = vld [vmem:[%s5212_s20 + $0x20] sm:$0xff]  ;;  %v451_v7 = vld [vmem:[%s5212_s20 + $0x28] sm:$0x3]  ;;  %p432_p4 = scmp.lt.s32.totalorder %s3769_s11, 15  ;;  %s6218_s30 = smov (!%p413_p2, %s3766_s30), 15 }
  0x24   : > { %v461_v8 = vpack.c.bf16 %v449_v5, %v449_v5  ;;  %v462_v9 = vpack.c.bf16 %v450_v6, %v450_v6  ;;  %v452_v10 = vld [vmem:[%s5212_s20 + $0x30] sm:$0xff]  ;;  %v453_v11 = vld [vmem:[%s5212_s20 + $0x38] sm:$0xff]  ;;  %v454_v12 = vld [vmem:[%s5212_s20 + $0x40] sm:$0x3]  ;;  %v463_v13 = vpack.c.bf16 %v451_v7, %v451_v7  ;;  %s4858_s12 = smul.u32 3, %s6218_s30 }
  0x25   : > { %4707 = vst [vmem:[#allocation2 + $0x18] sm:$0xff] %v4706_v3   ;;  %v455_v14 = vld [vmem:[%s5212_s20 + $0x48] sm:$0xff]  ;;  %v4711_v15 = vpack.c.bf16 %v453_v11, %v452_v10  ;;  %v456_v16 = vld [vmem:[%s5212_s20 + $0x50] sm:$0xff]  ;;  %v466_v17 = vpack.c.bf16 %v454_v12, %v454_v12  ;;  %v457_v18 = vld [vmem:[%s5212_s20 + $0x58] sm:$0x3]  ;;  %s6220_s11 = smov (!%p432_p4, %s3769_s11), 15 }
  0x26   : > { %473 = vst [vmem:[#allocation2 + $0x20] sm:$0x1] %v460_v4  ;;  %v467_v19 = vpack.c.bf16 %v455_v14, %v455_v14  ;;  %v468_v20 = vpack.c.bf16 %v456_v16, %v456_v16  ;;  %s4859_s21 = smul.u32 3, %s6220_s11  ;;  %v469_v21 = vpack.c.bf16 %v457_v18, %v457_v18  ;;  %s417_s23 = sadd.s32 %s4858_s12, %s5205_s9 }
  0x27   : > { %474 = vst [vmem:[#allocation2 + $0x24] sm:$0xf] %v461_v8  ;;  %s3767_s10 = sshll.u32 %s417_s23, 3  ;;  %s5237_s11 = scalar_lea.vmem [#allocation4], %s5201_s22 }
  0x28   : > { %475 = vst [vmem:[#allocation2 + $0x28] sm:$0xf] %v462_v9  ;;  %s436_s13 = sadd.s32 %s4859_s21, %s5205_s9  ;;  %s419_s18 = scalar_lea.vmem %s6172_s1, %s3767_s10 }
  0x29   : > { %476 = vst [vmem:[#allocation2 + $0x2c] sm:$0x1] %v463_v13  ;;  %s3770_s0 = sshll.u32 %s436_s13, 3 }
  0x2a   : > { %4783 = vst [vmem:[#allocation2 + $0x30] sm:$0xff] %v4711_v15   ;;  %s5234_s30 = scalar_lea.vmem %s6173_s2, %s3770_s0  ;;  %486 = sbr.rel (%p3771_p5) target bundleno = 54 (0x36), region = 52 }
  0x2b   : > { %479 = vst [vmem:[#allocation2 + $0x38] sm:$0x1] %v466_v17 }
  0x2c   : > { %480 = vst [vmem:[#allocation2 + $0x3c] sm:$0xf] %v467_v19 }
  0x2d   : > { %481 = vst [vmem:[#allocation2 + $0x40] sm:$0xf] %v468_v20 }
  0x2e   : > { %482 = vst [vmem:[#allocation2 + $0x44] sm:$0x1] %v469_v21 }
  0x2f   : > { %v5080_v22 = vmov 0  }
  0x30   : > { %487 = vst [vmem:[#allocation2] sm:$0xf] %v5080_v22 }
  0x31   : > { %488 = vst [vmem:[#allocation2 + $0x4] sm:$0xf] %v5080_v22 }
  0x32   : > { %489 = vst [vmem:[#allocation2 + $0x8] sm:$0x1] %v5080_v22 }
  0x33   : > { %490 = vst [vmem:[#allocation2 + $0xc] sm:$0xf] %v5080_v22 }
  0x34   : > { %491 = vst [vmem:[#allocation2 + $0x10] sm:$0xf] %v5080_v22 }
  0x35   : > { %492 = vst [vmem:[#allocation2 + $0x14] sm:$0x1] %v5080_v22 }
  0x36 PF: > { %p3772_p6 = scmp.le.s32.totalorder %s5062_s27, 0 }
  0x38   : > { %496 = sbr.rel (%p3772_p6) target bundleno = 69 (0x45), region = 56 }
  0x3d   : > { %v497_v23 = vld [vmem:[%s419_s18] sm:$0xff]  ;;  %v498_v24 = vld [vmem:[%s419_s18 + $0x8] sm:$0xff]  ;;  %v499_v25 = vld [vmem:[%s419_s18 + $0x10] sm:$0x3] }
  0x3e   : > { %v4716_v26 = vpack.c.bf16 %v498_v24, %v497_v23  ;;  %v505_v27 = vpack.c.bf16 %v499_v25, %v499_v25  ;;  %v500_v28 = vld [vmem:[%s419_s18 + $0x18] sm:$0xff]  ;;  %v501_v29 = vld [vmem:[%s419_s18 + $0x20] sm:$0xff]  ;;  %v502_v30 = vld [vmem:[%s419_s18 + $0x28] sm:$0x3] }
  0x3f   : > { %v506_v31 = vpack.c.bf16 %v500_v28, %v500_v28  ;;  %v507_v32 = vpack.c.bf16 %v501_v29, %v501_v29  ;;  %v508_v33 = vpack.c.bf16 %v502_v30, %v502_v30 }
  0x40   : > { %4717 = vst [vmem:[#allocation2] sm:$0xff] %v4716_v26  }
  0x41   : > { %511 = vst [vmem:[#allocation2 + $0x8] sm:$0x1] %v505_v27 }
  0x42   : > { %512 = vst [vmem:[#allocation2 + $0xc] sm:$0xf] %v506_v31 }
  0x43   : > { %513 = vst [vmem:[#allocation2 + $0x10] sm:$0xf] %v507_v32 }
  0x44   : > { %514 = vst [vmem:[#allocation2 + $0x14] sm:$0x1] %v508_v33 }
  0x45 PF: > { %p3773_p7 = scmp.ne.s32.totalorder %s5062_s27, 3 }
  0x47   : > { %518 = sbr.rel (%p3773_p7) target bundleno = 83 (0x53), region = 60 }
  0x4c   : > { %v5081_v34 = vmov 0  }
  0x4d   : > { %520 = vst [vmem:[#allocation2 + $0x48] sm:$0xf] %v5081_v34 }
  0x4e   : > { %521 = vst [vmem:[#allocation2 + $0x4c] sm:$0xf] %v5081_v34 }
  0x4f   : > { %522 = vst [vmem:[#allocation2 + $0x50] sm:$0x1] %v5081_v34 }
  0x50   : > { %523 = vst [vmem:[#allocation2 + $0x54] sm:$0xf] %v5081_v34 }
  0x51   : > { %524 = vst [vmem:[#allocation2 + $0x58] sm:$0xf] %v5081_v34 }
  0x52   : > { %525 = vst [vmem:[#allocation2 + $0x5c] sm:$0x1] %v5081_v34 }
  0x53 PF: > { %p3774_p9 = scmp.ge.s32.totalorder %s5062_s27, 3 }
  0x55   : > { %529 = sbr.rel (%p3774_p9) target bundleno = 98 (0x62), region = 64 }
  0x5a   : > { %v530_v35 = vld [vmem:[%s5234_s30] sm:$0xff]  ;;  %v531_v36 = vld [vmem:[%s5234_s30 + $0x8] sm:$0xff]  ;;  %v532_v37 = vld [vmem:[%s5234_s30 + $0x10] sm:$0x3] }
  0x5b   : > { %v4721_v38 = vpack.c.bf16 %v531_v36, %v530_v35  ;;  %v538_v39 = vpack.c.bf16 %v532_v37, %v532_v37  ;;  %v533_v40 = vld [vmem:[%s5234_s30 + $0x18] sm:$0xff]  ;;  %v534_v41 = vld [vmem:[%s5234_s30 + $0x20] sm:$0xff]  ;;  %v535_v42 = vld [vmem:[%s5234_s30 + $0x28] sm:$0x3] }
  0x5c   : > { %v539_v43 = vpack.c.bf16 %v533_v40, %v533_v40  ;;  %v540_v44 = vpack.c.bf16 %v534_v41, %v534_v41  ;;  %v541_v45 = vpack.c.bf16 %v535_v42, %v535_v42 }
  0x5d   : > { %4722 = vst [vmem:[#allocation2 + $0x48] sm:$0xff] %v4721_v38  }
  0x5e   : > { %545 = vst [vmem:[#allocation2 + $0x50] sm:$0x1] %v538_v39 }
  0x5f   : > { %546 = vst [vmem:[#allocation2 + $0x54] sm:$0xf] %v539_v43 }
  0x60   : > { %547 = vst [vmem:[#allocation2 + $0x58] sm:$0xf] %v540_v44 }
  0x61   : > { %548 = vst [vmem:[#allocation2 + $0x5c] sm:$0x1] %v541_v45 }
  0x62 PF: > { %v4589_v46 = vld [vmem:[%s6174_s3 + $0xf8] sm:$0xff]  ;;  %v4588_v50 = vld [vmem:[%s6174_s3 + $0xf0] sm:$0xff]  ;;  %v4587_v54 = vld [vmem:[%s6174_s3 + $0xe8] sm:$0xff]  ;;  %vm627_vm0 = vsmask.f32 7424  ;;  %vm724_vm1 = vcmask 1046528  }
  0x63   : > { %v4597_v47 = vld [vmem:[%s6174_s3 + $0x138] sm:$0xff]  ;;  %1189 = vmatpush.bf16.msra.mxu0 %v4589_v46  ;;  %v4596_v51 = vld [vmem:[%s6174_s3 + $0x130] sm:$0xff]  ;;  %v4595_v55 = vld [vmem:[%s6174_s3 + $0x128] sm:$0xff]  ;;  %vm2211_vm2 = vcmask 1040384   ;;  %vm2212_vm3 = vsmask.f32 256 }
  0x64   : > { %v4605_v48 = vld [vmem:[%s6174_s3 + $0x178] sm:$0xff]  ;;  %1228 = vmatpush.bf16.msra.mxu1 %v4597_v47  ;;  %v4604_v52 = vld [vmem:[%s6174_s3 + $0x170] sm:$0xff]  ;;  %v4603_v56 = vld [vmem:[%s6174_s3 + $0x168] sm:$0xff] }
  0x65   : > { %v4565_v49 = vld [vmem:[%s6174_s3 + $0x38] sm:$0xff]  ;;  %1267 = vmatpush.bf16.msra.mxu2 %v4605_v48  ;;  %v4564_v53 = vld [vmem:[%s6174_s3 + $0x30] sm:$0xff]  ;;  %v4563_v57 = vld [vmem:[%s6174_s3 + $0x28] sm:$0xff] }
  0x66   : > { %1450 = vmatpush.bf16.msra.mxu3 %v4565_v49  ;;  %v4586_v58 = vld [vmem:[%s6174_s3 + $0xe0] sm:$0xff]  ;;  %v5295_v60 = vld [vmem:[#allocation2 + $0xc] sm:$0xff]   ;;  %v810_v0 = vld [vmem:[#allocation2 + $0x14] sm:$0x1] }
  0x67   : > { %1190 = vmatpush.bf16.msra.mxu0 %v4588_v50  ;;  %v4594_v59 = vld [vmem:[%s6174_s3 + $0x120] sm:$0xff]  ;;  %v4939_v61 = vld [vmem:[#allocation2 + $0xc] sm:$0xf0]  ;;  %v4585_v1 = vld [vmem:[%s6174_s3 + $0xd8] sm:$0xff]  ;;  %v864_v3 = vunpack.c.l.b16 %v810_v0  ;;  %v879_v10 = vshll.u32 %v5295_v60, 16  ;;  %v877_v15 = vshrl.u32 %v5295_v60, 16 }
  0x68   : > { %1229 = vmatpush.bf16.msra.mxu1 %v4596_v51  ;;  %v4602_v62 = vld [vmem:[%s6174_s3 + $0x160] sm:$0xff]  ;;  %v4593_v2 = vld [vmem:[%s6174_s3 + $0x118] sm:$0xff]  ;;  %v4940_v6 = vld [vmem:[#allocation2 + $0xc] sm:$0xe] }
  0x69   : > { %1268 = vmatpush.bf16.msra.mxu2 %v4604_v52  ;;  %v4562_v63 = vld [vmem:[%s6174_s3 + $0x20] sm:$0xff]  ;;  %v4601_v4 = vld [vmem:[%s6174_s3 + $0x158] sm:$0xff]  ;;  %v4584_v7 = vld [vmem:[%s6174_s3 + $0xd0] sm:$0xff]  ;;  %v870_v9 = vpack.c.b16 %v864_v3, %v864_v3  ;;  %v881_v16 = vrot.slane %v879_v10, 1  ;;  %v4941_v20 = vor.u32 %v4940_v6, %v4939_v61 }
  0x6a   : > { %1451 = vmatpush.bf16.msra.mxu3 %v4564_v53  ;;  %v4561_v5 = vld [vmem:[%s6174_s3 + $0x18] sm:$0xff]  ;;  %v4592_v8 = vld [vmem:[%s6174_s3 + $0x110] sm:$0xff]  ;;  %v4583_v13 = vld [vmem:[%s6174_s3 + $0xc8] sm:$0xff] }
  0x6b   : > { %1191 = vmatpush.bf16.msra.mxu0 %v4587_v54  ;;  %v4600_v11 = vld [vmem:[%s6174_s3 + $0x150] sm:$0xff]  ;;  %v4591_v14 = vld [vmem:[%s6174_s3 + $0x108] sm:$0xff]  ;;  %v884_v17 = vshll.u32 %v870_v9, 16  ;;  %v4582_v21 = vld [vmem:[%s6174_s3 + $0xc0] sm:$0xff]  ;;  %v882_v23 = vor.u32 %v881_v16, %v877_v15  ;;  %v972_v27 = vrot.slane %v4941_v20, 1  ;;  %v973_v28 = vrot.slane %v870_v9, 1 }
  0x6c   : > { %1230 = vmatpush.bf16.msra.mxu1 %v4595_v55  ;;  %v4560_v12 = vld [vmem:[%s6174_s3 + $0x10] sm:$0xff]  ;;  %v4599_v18 = vld [vmem:[%s6174_s3 + $0x148] sm:$0xff]  ;;  %v4590_v22 = vld [vmem:[%s6174_s3 + $0x100] sm:$0xff] }
  0x6d   : > { %1269 = vmatpush.bf16.msra.mxu2 %v4603_v56  ;;  %v4559_v19 = vld [vmem:[%s6174_s3 + $0x8] sm:$0xff]  ;;  %v886_v24 = vrot.slane %v884_v17, 1  ;;  %v4598_v25 = vld [vmem:[%s6174_s3 + $0x140] sm:$0xff]  ;;  %v4573_v30 = vld [vmem:[%s6174_s3 + $0x78] sm:$0xff]  ;;  %v974_v34 = vsel %vm724_vm1, %v972_v27, %v973_v28 }
  0x6e   : > { %1452 = vmatpush.bf16.msra.mxu3 %v4563_v57  ;;  %v4558_v26 = vld [vmem:[%s6174_s3] sm:$0xff]  ;;  %v5357_v32 = vld [vmem:[#allocation2 + $0x18] sm:$0xff]   ;;  %v4572_v36 = vld [vmem:[%s6174_s3 + $0x70] sm:$0xff] }
  0x6f   : > { %1192 = vmatpush.bf16.msra.mxu0 %v4586_v58  ;;  %v811_v29 = vld [vmem:[#allocation2 + $0x20] sm:$0x1]  ;;  %v887_v31 = vsel %vm627_vm0, %v882_v23, %v886_v24  ;;  %v891_v37 = vshll.u32 %v5357_v32, 16  ;;  %v4798_v39 = vld [vmem:[#allocation2 + $0x18] sm:$0xf0]  ;;  %v4571_v41 = vld [vmem:[%s6174_s3 + $0x68] sm:$0xff] }
  0x70   : > { %1231 = vmatpush.bf16.msra.mxu1 %v4594_v59  ;;  %v865_v33 = vunpack.c.l.b16 %v811_v29  ;;  %v5360_v35 = vld [vmem:[#allocation2] sm:$0xff]   ;;  %v4799_v40 = vld [vmem:[#allocation2 + $0x18] sm:$0xe]  ;;  %v889_v42 = vshrl.u32 %v5357_v32, 16  ;;  %v5372_v45 = vld [vmem:[#allocation2 + $0xc] sm:$0xff]  }
  0x71   : > { %1270 = vmatpush.bf16.msra.mxu2 %v4602_v62  ;;  %v893_v43 = vrot.slane %v891_v37, 1  ;;  %v5374_v46 = vld [vmem:[#allocation2 + $0xc] sm:$0xf0]  ;;  %v4800_v47 = vor.u32 %v4799_v40, %v4798_v39  ;;  %v802_v48 = vld [vmem:[#allocation2 + $0x24] sm:$0xff]   ;;  %v812_v55 = vld [vmem:[#allocation2 + $0x2c] sm:$0x1] }
  0x72   : > { %1453 = vmatpush.bf16.msra.mxu3 %v4562_v63  ;;  %v871_v38 = vpack.c.b16 %v865_v33, %v865_v33  ;;  %v4942_v49 = vld [vmem:[#allocation2 + $0x24] sm:$0xf0]  ;;  %v4570_v50 = vld [vmem:[%s6174_s3 + $0x60] sm:$0xff]  ;;  %v866_v57 = vunpack.c.l.b16 %v812_v55  ;;  %v903_v61 = vshll.u32 %v802_v48, 16  ;;  %v4569_v62 = vld [vmem:[%s6174_s3 + $0x58] sm:$0xff]  ;;  %v901_v0 = vshrl.u32 %v802_v48, 16 }
  0x73   : > { %1193 = vmatpush.bf16.msra.mxu0 %v4585_v1  ;;  %v5379_v51 = vor.u32 %v893_v43, %v889_v42  ;;  %v975_v53 = vrot.slane %v4800_v47, 1  ;;  %v4943_v59 = vld [vmem:[#allocation2 + $0x24] sm:$0xe]  ;;  %v4568_v63 = vld [vmem:[%s6174_s3 + $0x50] sm:$0xff]  ;;  %v813_v6 = vld [vmem:[#allocation2 + $0x38] sm:$0x1] }
  0x74   : > { %1232 = vmatpush.bf16.msra.mxu1 %v4593_v2  ;;  %v896_v44 = vshll.u32 %v871_v38, 16  ;;  %v976_v54 = vrot.slane %v871_v38, 1  ;;  %v905_v1 = vrot.slane %v903_v61, 1  ;;  %v4944_v3 = vor.u32 %v4943_v59, %v4942_v49  ;;  %v4581_v15 = vld [vmem:[%s6174_s3 + $0xb8] sm:$0xff]  ;;  %v4567_v16 = vld [vmem:[%s6174_s3 + $0x48] sm:$0xff]  ;;  %v4576_v49 = vld [vmem:[%s6174_s3 + $0x90] sm:$0xff] }
  0x75   : > { %1271 = vmatpush.bf16.msra.mxu2 %v4601_v4  ;;  %v867_v9 = vunpack.c.l.b16 %v813_v6  ;;  %v4801_v17 = vld [vmem:[#allocation2 + $0x30] sm:$0xf0]  ;;  %v5408_v24 = vld [vmem:[#allocation2 + $0x24] sm:$0xff]   ;;  %v4945_v27 = vld [vmem:[#allocation2 + $0x3c] sm:$0xf0] }
  0x76   : > { %1454 = vmatpush.bf16.msra.mxu3 %v4561_v5  ;;  %v898_v52 = vrot.slane %v896_v44, 1  ;;  %v977_v58 = vsel %vm724_vm1, %v975_v53, %v976_v54  ;;  %v906_v4 = vor.u32 %v905_v1, %v901_v0  ;;  %v4579_v28 = vld [vmem:[%s6174_s3 + $0xa8] sm:$0xff]  ;;  %v4946_v40 = vld [vmem:[#allocation2 + $0x3c] sm:$0xe]  ;;  %v4566_v44 = vld [vmem:[%s6174_s3 + $0x40] sm:$0xff] }
  0x77   : > { %1194 = vmatpush.bf16.msra.mxu0 %v4584_v7  ;;  %v978_v7 = vrot.slane %v4944_v3, 1  ;;  %v4577_v43 = vld [vmem:[%s6174_s3 + $0x98] sm:$0xff]  ;;  %v4947_v54 = vor.u32 %v4946_v40, %v4945_v27  ;;  %v4575_v55 = vld [vmem:[%s6174_s3 + $0x88] sm:$0xff]  ;;  %v4574_v61 = vld [vmem:[%s6174_s3 + $0x80] sm:$0xff] }
  0x78   : > { %1233 = vmatpush.bf16.msra.mxu1 %v4592_v8  ;;  %v899_v56 = vsel %vm627_vm0, %v5379_v51, %v898_v52  ;;  %v4613_v47 = vld [vmem:[%s6174_s3 + $0x1b8] sm:$0xff]  ;;  %v5448_v1 = vld [vmem:[#allocation2 + $0x48] sm:$0xff]   ;;  %v4612_v3 = vld [vmem:[%s6174_s3 + $0x1b0] sm:$0xff] }
  0x79   : > { %1272 = vmatpush.bf16.msra.mxu2 %v4600_v11  ;;  %v5393_v11 = vld [vmem:[#allocation2 + $0x30] sm:$0xff]   ;;  %v4611_v27 = vld [vmem:[%s6174_s3 + $0x1a8] sm:$0xff]  ;;  %vm5661_vm4 = vmand %vm2211_vm2, %vm2212_vm3 }
  0x7a   : > { %1455 = vmatpush.bf16.msra.mxu3 %v4560_v12  ;;  %v913_v20 = vshrl.u32 %v5393_v11, 16 }
  0x7b   : > { %1195 = vmatpush.bf16.msra.mxu0 %v4583_v13  ;;  %v915_v13 = vshll.u32 %v5393_v11, 16 }
  0x7c   : > { %1234 = vmatpush.bf16.msra.mxu1 %v4591_v14  ;;  %v873_v14 = vpack.c.b16 %v867_v9, %v867_v9  ;;  %v4805_v9 = vld [vmem:[#allocation2 + $0x48] sm:$0xe] }
  0x7d   : > { %1273 = vmatpush.bf16.msra.mxu2 %v4599_v18  ;;  %v4802_v18 = vld [vmem:[#allocation2 + $0x30] sm:$0xe] }
  0x7e   : > { %1456 = vmatpush.bf16.msra.mxu3 %v4559_v19  ;;  %v4580_v19 = vld [vmem:[%s6174_s3 + $0xb0] sm:$0xff]  ;;  %v4803_v23 = vor.u32 %v4802_v18, %v4801_v17  ;;  %v982_v33 = vrot.slane %v873_v14, 1 }
  0x7f   : > { %1196 = vmatpush.bf16.msra.mxu0 %v4582_v21  ;;  %v917_v21 = vrot.slane %v915_v13, 1 }
  0x80   : > { %1235 = vmatpush.bf16.msra.mxu1 %v4590_v22  ;;  %v920_v22 = vshll.u32 %v873_v14, 16 }
  0x81   : > { %1274 = vmatpush.bf16.msra.mxu2 %v4598_v25  ;;  %v5410_v25 = vld [vmem:[#allocation2 + $0x24] sm:$0xf0]  ;;  %v5415_v29 = vor.u32 %v917_v21, %v913_v20 }
  0x82   : > { %1457 = vmatpush.bf16.msra.mxu3 %v4558_v26  ;;  %1197 = vmatmul.bf16.vlgmr.msra.gmra.mxu0 %v5295_v60  ;;  %v872_v60 = vpack.c.b16 %v866_v57, %v866_v57  ;;  %v806_v26 = vld [vmem:[#allocation2 + $0x3c] sm:$0xff]   ;;  %v561_v21 = vld [vmem:[#allocation2 + $0x8] sm:$0x1] }
  0x83   : > { %1489 = vmatpush.bf16.msrb.mxu0 %v4573_v30  ;;  %1236 = vmatmul.bf16.vlgmr.msra.gmra.mxu1 %v887_v31  ;;  %v922_v30 = vrot.slane %v920_v22, 1  ;;  %v981_v31 = vrot.slane %v4803_v23, 1  ;;  %v927_v42 = vshll.u32 %v806_v26, 16  ;;  %v615_v23 = vunpack.c.l.b16 %v561_v21  ;;  %v564_v21 = vld [vmem:[#allocation2 + $0x2c] sm:$0x1] }
  0x84   : > { %1275 = vmatmul.bf16.vlgmr.msra.gmra.mxu2 %v974_v34  ;;  %v908_v2 = vshll.u32 %v872_v60, 16  ;;  %v979_v8 = vrot.slane %v872_v60, 1  ;;  %1528 = vmatpush.bf16.msrb.mxu1 %v4581_v15  ;;  %v814_v34 = vld [vmem:[#allocation2 + $0x44] sm:$0x1]  ;;  %v815_v60 = vld [vmem:[#allocation2 + $0x50] sm:$0x1] }
  0x85   : > { %1458 = vmatmul.bf16.vlgmr.msra.gmra.mxu3 %v5360_v35  ;;  %v923_v37 = vsel %vm627_vm0, %v5415_v29, %v922_v30  ;;  %v868_v38 = vunpack.c.l.b16 %v814_v34  ;;  %v983_v39 = vsel %vm724_vm1, %v981_v31, %v982_v33  ;;  %1958 = vmatpush.bf16.msrb.mxu2 %v4613_v47  ;;  %v929_v52 = vrot.slane %v927_v42, 1  ;;  %v5465_v15 = vld [vmem:[#allocation2 + $0x3c] sm:$0xff]   ;;  %v4627_v30 = vld [vmem:[%s6174_s3 + $0x228] sm:$0xff]  ;;  %v4786_v34 = vld [vmem:[#allocation2] sm:$0xf0] }
  0x86   : > { %v910_v5 = vrot.slane %v908_v2, 1  ;;  %v980_v12 = vsel %vm724_vm1, %v978_v7, %v979_v8  ;;  %v4629_v2 = vld [vmem:[%s6174_s3 + $0x238] sm:$0xff]  ;;  %v4628_v7 = vld [vmem:[%s6174_s3 + $0x230] sm:$0xff]  ;;  %v4804_v8 = vld [vmem:[#allocation2 + $0x48] sm:$0xf0]  ;;  %v631_v31 = vshll.u32 %v5360_v35, 16  ;;  %v621_v33 = vpack.c.b16 %v615_v23, %v615_v23 }
  0x87   : > { %1490 = vmatpush.bf16.msrb.mxu0 %v4572_v36  ;;  %v4578_v36 = vld [vmem:[%s6174_s3 + $0xa0] sm:$0xff]  ;;  %v4806_v14 = vor.u32 %v4805_v9, %v4804_v8  ;;  %v4789_v8 = vld [vmem:[#allocation2 + $0x18] sm:$0xf0]  ;;  %v4790_v9 = vld [vmem:[#allocation2 + $0x18] sm:$0xe] }
  0x88   : > { %v911_v10 = vsel %vm627_vm0, %v906_v4, %v910_v5  ;;  %1529 = vmatpush.bf16.msrb.mxu1 %v4580_v19  ;;  %v4620_v4 = vld [vmem:[%s6174_s3 + $0x1f0] sm:$0xff]  ;;  %v939_v5 = vshll.u32 %v5448_v1, 16  ;;  %v633_v40 = vrot.slane %v631_v31, 1 }
  0x89   : > { %1959 = vmatpush.bf16.msrb.mxu2 %v4612_v3  ;;  %v987_v19 = vrot.slane %v4806_v14, 1  ;;  %v4616_v14 = vld [vmem:[%s6174_s3 + $0x1d0] sm:$0xff] }
  0x8b   : > { %1491 = vmatpush.bf16.msrb.mxu0 %v4571_v41  ;;  %v874_v41 = vpack.c.b16 %v868_v38, %v868_v38  ;;  %v4618_v38 = vld [vmem:[%s6174_s3 + $0x1e0] sm:$0xff] }
  0x8c   : > { %1530 = vmatpush.bf16.msrb.mxu1 %v4579_v28  ;;  %v4619_v28 = vld [vmem:[%s6174_s3 + $0x1e8] sm:$0xff] }
  0x8d   : > { %v932_v53 = vshll.u32 %v874_v41, 16  ;;  %v985_v59 = vrot.slane %v874_v41, 1  ;;  %1960 = vmatpush.bf16.msrb.mxu2 %v4611_v27  ;;  %v636_v41 = vshll.u32 %v621_v33, 16 }
  0x8f   : > { %1492 = vmatpush.bf16.msrb.mxu0 %v4570_v50  ;;  %v925_v50 = vshrl.u32 %v806_v26, 16  ;;  %v934_v57 = vrot.slane %v932_v53, 1 }
  0x90   : > { %1531 = vmatpush.bf16.msrb.mxu1 %v4578_v36  ;;  %v4787_v36 = vld [vmem:[#allocation2] sm:$0xe] }
  0x91   : > { %v4788_v42 = vor.u32 %v4787_v36, %v4786_v34  ;;  %v4607_v34 = vld [vmem:[%s6174_s3 + $0x188] sm:$0xff] }
  0x92   : > { %1202 = vmatmul.bf16.gmra.mxu0 %v5357_v32  ;;  %v4615_v36 = vld [vmem:[%s6174_s3 + $0x1c8] sm:$0xff] }
  0x93   : > { %1241 = vmatmul.bf16.gmra.mxu1 %v899_v56  ;;  %1493 = vmatpush.bf16.msrb.mxu0 %v4569_v62  ;;  %v930_v56 = vor.u32 %v929_v52, %v925_v50  ;;  %v725_v47 = vrot.slane %v4788_v42, 1 }
  0x94   : > { %1280 = vmatmul.bf16.gmra.mxu2 %v977_v58  ;;  %1532 = vmatpush.bf16.msrb.mxu1 %v4577_v43  ;;  %v984_v58 = vrot.slane %v4947_v54, 1  ;;  %v4949_v54 = vld [vmem:[#allocation2 + $0xc] sm:$0xe] }
  0x95   : > { %1463 = vmatmul.bf16.gmra.mxu3 %v5372_v45  ;;  %v935_v62 = vsel %vm627_vm0, %v930_v56, %v934_v57  ;;  %v641_v56 = vshrl.u32 %v5372_v45, 16 }
  0x96   : > { %v986_v0 = vsel %vm724_vm1, %v984_v58, %v985_v59  ;;  %v4950_v59 = vor.u32 %v4949_v54, %v5374_v46  ;;  %v563_v46 = vld [vmem:[#allocation2 + $0x20] sm:$0x1] }
  0x97   : > { %1494 = vmatpush.bf16.msrb.mxu0 %v4568_v63  ;;  %v869_v63 = vunpack.c.l.b16 %v815_v60  ;;  %v4626_v60 = vld [vmem:[%s6174_s3 + $0x220] sm:$0xff] }
  0x98   : > { %1533 = vmatpush.bf16.msrb.mxu1 %v4576_v49  ;;  %v562_v49 = vld [vmem:[#allocation2 + $0x14] sm:$0x1]  ;;  %v1579_v54 = vld [vmem:[#allocation2 + $0x20] sm:$0x1] }
  0x99   : > { %v875_v6 = vpack.c.b16 %v869_v63, %v869_v63  ;;  %v616_v53 = vunpack.c.l.b16 %v562_v49 }
  0x9b   : > { %1495 = vmatpush.bf16.msrb.mxu0 %v4567_v16  ;;  %v944_v13 = vshll.u32 %v875_v6, 16  ;;  %v5467_v16 = vld [vmem:[#allocation2 + $0x3c] sm:$0xf0]  ;;  %v988_v20 = vrot.slane %v875_v6, 1  ;;  %v4625_v6 = vld [vmem:[%s6174_s3 + $0x218] sm:$0xff] }
  0x9c   : > { %1534 = vmatpush.bf16.msrb.mxu1 %v4575_v55  ;;  %v622_v55 = vpack.c.b16 %v616_v53, %v616_v53  ;;  %v4623_v53 = vld [vmem:[%s6174_s3 + $0x208] sm:$0xff] }
  0x9d   : > { %v946_v18 = vrot.slane %v944_v13, 1  ;;  %v4608_v13 = vld [vmem:[%s6174_s3 + $0x190] sm:$0xff] }
  0x9e   : > { %v648_v58 = vshll.u32 %v622_v55, 16 }
  0x9f   : > { %1496 = vmatpush.bf16.msrb.mxu0 %v4566_v44  ;;  %v638_v44 = vrot.slane %v636_v41, 1  ;;  %v665_v41 = vshrl.u32 %v5408_v24, 16 }
  0xa0   : > { %1535 = vmatpush.bf16.msrb.mxu1 %v4574_v61  ;;  %v4609_v61 = vld [vmem:[%s6174_s3 + $0x198] sm:$0xff] }
  0xa2   : > { %1207 = vmatmul.bf16.gmra.mxu0 %v802_v48  ;;  %v4621_v48 = vld [vmem:[%s6174_s3 + $0x1f8] sm:$0xff] }
  0xa3   : > { %1246 = vmatmul.bf16.gmra.mxu1 %v911_v10  ;;  %1997 = vmatpush.bf16.msrb.mxu3 %v4621_v48  ;;  %v937_v10 = vshrl.u32 %v5448_v1, 16  ;;  %v726_v48 = vrot.slane %v621_v33, 1  ;;  %v4952_v33 = vld [vmem:[#allocation2 + $0x24] sm:$0xe] }
  0xa4   : > { %1285 = vmatmul.bf16.gmra.mxu2 %v980_v12  ;;  %2036 = vmatpush.bf16.msra.mxu0 %v4629_v2  ;;  %v941_v12 = vrot.slane %v939_v5, 1  ;;  %v729_v2 = vrot.slane %v622_v55, 1  ;;  %v617_v5 = vunpack.c.l.b16 %v563_v46  ;;  %v4953_v49 = vor.u32 %v4952_v33, %v5410_v25  ;;  %v4606_v25 = vld [vmem:[%s6174_s3 + $0x180] sm:$0xff] }
  0xa5   : > { %1468 = vmatmul.bf16.gmra.mxu3 %v5357_v32  ;;  %v727_v52 = vsel %vm724_vm1, %v725_v47, %v726_v48  ;;  %v1633_v55 = vunpack.c.l.b16 %v1579_v54 }
  0xa6   : > { %v5469_v17 = vor.u32 %v941_v12, %v937_v10  ;;  %v4791_v12 = vor.u32 %v4790_v9, %v4789_v8 }
  0xa7   : > { %1998 = vmatpush.bf16.msrb.mxu3 %v4620_v4 }
  0xa8   : > { %2037 = vmatpush.bf16.msra.mxu0 %v4628_v7  ;;  %v947_v22 = vsel %vm627_vm0, %v5469_v17, %v946_v18  ;;  %v623_v7 = vpack.c.b16 %v617_v5, %v617_v5 }
  0xaa   : > { %v660_v10 = vshll.u32 %v623_v7, 16 }
  0xab   : > { %1999 = vmatpush.bf16.msrb.mxu3 %v4619_v28  ;;  %v618_v28 = vunpack.c.l.b16 %v564_v21 }
  0xac   : > { %2038 = vmatpush.bf16.msra.mxu0 %v4627_v30  ;;  %v662_v18 = vrot.slane %v660_v10, 1  ;;  %v4624_v30 = vld [vmem:[%s6174_s3 + $0x210] sm:$0xff] }
  0xad   : > { %v4792_v10 = vld [vmem:[#allocation2 + $0x30] sm:$0xf0] }
  0xaf   : > { %2000 = vmatpush.bf16.msrb.mxu3 %v4618_v38  ;;  %v667_v38 = vshll.u32 %v5408_v24, 16 }
  0xb0   : > { %2039 = vmatpush.bf16.msra.mxu0 %v4626_v60 }
  0xb1   : > { %v669_v47 = vrot.slane %v667_v38, 1 }
  0xb2   : > { %1212 = vmatmul.bf16.gmra.mxu0 %v5393_v11 }
  0xb3   : > { %1251 = vmatmul.bf16.gmra.mxu1 %v923_v37  ;;  %v4610_v37 = vld [vmem:[%s6174_s3 + $0x1a0] sm:$0xff] }
  0xb4   : > { %1290 = vmatmul.bf16.gmra.mxu2 %v983_v39  ;;  %v629_v39 = vshrl.u32 %v5360_v35, 16  ;;  %v643_v35 = vshll.u32 %v5372_v45, 16  ;;  %v728_v45 = vrot.slane %v4950_v59, 1  ;;  %2040 = vmatpush.bf16.msra.mxu0 %v4625_v6  ;;  %v5538_v59 = vpack.c.b16 %v1633_v55, %v1633_v55  ;;  %v4955_v55 = vld [vmem:[#allocation2 + $0x3c] sm:$0xe] }
  0xb5   : > { %1473 = vmatmul.bf16.gmra.mxu3 %v5408_v24  ;;  %1961 = vmatpush.bf16.msrb.mxu2 %v4610_v37  ;;  %v624_v37 = vpack.c.b16 %v618_v28, %v618_v28 }
  0xb6   : > { %v634_v43 = vor.u32 %v633_v40, %v629_v39  ;;  %v645_v57 = vrot.slane %v643_v35, 1  ;;  %v730_v4 = vsel %vm724_vm1, %v728_v45, %v729_v2  ;;  %v670_v35 = vor.u32 %v669_v47, %v665_v41 }
  0xb7   : > { %v672_v48 = vshll.u32 %v624_v37, 16  ;;  %v735_v24 = vrot.slane %v624_v37, 1 }
  0xb8   : > { %v639_v50 = vsel %vm627_vm0, %v634_v43, %v638_v44  ;;  %v646_v63 = vor.u32 %v645_v57, %v641_v56  ;;  %2041 = vmatpush.bf16.msra.mxu0 %v4624_v30  ;;  %v734_v57 = vrot.slane %v4953_v49, 1 }
  0xb9   : > { %1962 = vmatpush.bf16.msrb.mxu2 %v4609_v61  ;;  %v674_v56 = vrot.slane %v672_v48, 1 }
  0xbb   : > { %v675_v46 = vsel %vm627_vm0, %v670_v35, %v674_v56 }
  0xbc   : > { %2042 = vmatpush.bf16.msra.mxu0 %v4623_v53 }
  0xbd   : > { %1963 = vmatpush.bf16.msrb.mxu2 %v4608_v13 }
  0xc1   : > { %1964 = vmatpush.bf16.msrb.mxu2 %v4607_v34 }
  0xc2   : > { %1217 = vmatmul.bf16.gmra.mxu0 %v806_v26  ;;  %v989_v26 = vsel %vm724_vm1, %v987_v19, %v988_v20  ;;  %v731_v19 = vrot.slane %v4791_v12, 1  ;;  %v732_v20 = vrot.slane %v623_v7, 1  ;;  %v4793_v12 = vld [vmem:[#allocation2 + $0x30] sm:$0xe] }
  0xc3   : > { %1256 = vmatmul.bf16.gmra.mxu1 %v935_v62  ;;  %v4617_v62 = vld [vmem:[%s6174_s3 + $0x1d8] sm:$0xff] }
  0xc4   : > { %1295 = vmatmul.bf16.gmra.mxu2 %v986_v0  ;;  %v650_v0 = vrot.slane %v648_v58, 1  ;;  %2001 = vmatpush.bf16.msrb.mxu3 %v4617_v62  ;;  %v733_v27 = vsel %vm724_vm1, %v731_v19, %v732_v20  ;;  %v565_v58 = vld [vmem:[#allocation2 + $0x38] sm:$0x1]  ;;  %v4614_v62 = vld [vmem:[%s6174_s3 + $0x1c0] sm:$0xff] }
  0xc5   : > { %1478 = vmatmul.bf16.gmra.mxu3 %v5393_v11  ;;  %1965 = vmatpush.bf16.msrb.mxu2 %v4606_v25 }
  0xc6   : > { %v651_v3 = vsel %vm627_vm0, %v646_v63, %v650_v0  ;;  %v1653_v63 = vshll.u32 %v5538_v59, 16 }
  0xc8   : > { %2002 = vmatpush.bf16.msrb.mxu3 %v4616_v14  ;;  %v1655_v6 = vrot.slane %v1653_v63, 1 }
  0xca   : > { %v1656_v8 = vsel %vm627_vm0, %v5379_v51, %v1655_v6  ;;  %v1581_v6 = vld [vmem:[#allocation2 + $0x38] sm:$0x1] }
  0xcc   : > { %2003 = vmatpush.bf16.msrb.mxu3 %v4615_v36  ;;  %v566_v36 = vld [vmem:[#allocation2 + $0x44] sm:$0x1] }
  0xcd   : > { %v620_v53 = vunpack.c.l.b16 %v566_v36 }
  0xd0   : > { %2004 = vmatpush.bf16.msrb.mxu3 %v4614_v62  ;;  %v689_v62 = vshrl.u32 %v5465_v15, 16 }
  0xd2   : > { %1222 = vmatmul.bf16.gmra.mxu0 %v5448_v1 }
  0xd3   : > { %1261 = vmatmul.bf16.gmra.mxu1 %v947_v22 }
  0xd4   : > { %1300 = vmatmul.bf16.gmra.mxu2 %v989_v26  ;;  %v663_v26 = vsel %vm627_vm0, %v5379_v51, %v662_v18 }
  0xd5   : > { %1483 = vmatmul.bf16.gmra.mxu3 %v5465_v15 }
  0xe2   : > { %1497 = vmatmul.bf16.vlgmr.msrb.gmra.mxu0 %v639_v50 }
  0xe3   : > { %1536 = vmatmul.bf16.vlgmr.msrb.gmra.mxu1 %v727_v52 }
  0xe4   : > { %1966 = vmatmul.bf16.vlgmr.msrb.gmra.mxu2 %v5357_v32  ;;  %v1580_v32 = vld [vmem:[#allocation2 + $0x2c] sm:$0x1] }
  0xe5   : > { %2005 = vmatmul.bf16.vlgmr.msrb.gmra.mxu3 %v1656_v8  ;;  %v1634_v30 = vunpack.c.l.b16 %v1580_v32  ;;  %v1635_v8 = vunpack.c.l.b16 %v1581_v6 }
  0xe7   : > { %v5561_v37 = vpack.c.b16 %v1634_v30, %v1634_v30 }
  0xf2   : > { %1502 = vmatmul.bf16.gmra.mxu0 %v651_v3  ;;  %v736_v3 = vsel %vm724_vm1, %v734_v57, %v735_v24 }
  0xf3   : > { %1541 = vmatmul.bf16.gmra.mxu1 %v730_v4  ;;  %v619_v4 = vunpack.c.l.b16 %v565_v58  ;;  %v626_v58 = vpack.c.b16 %v620_v53, %v620_v53 }
  0xf5   : > { %v625_v9 = vpack.c.b16 %v619_v4, %v619_v4 }
  0xf7   : > { %v684_v21 = vshll.u32 %v625_v9, 16  ;;  %v738_v34 = vrot.slane %v625_v9, 1 }
  0xff   : > { %v1198_v22 = vpop.f32.mrf.mxu0 }
 0x100   : > { %v1237_v23 = vpop.f32.mrf.mxu1 }
 0x101   : > { %v1238_v31 = vadd.f32 %v1237_v23, %v1198_v22  ;;  %v4794_v22 = vor.u32 %v4793_v12, %v4792_v10  ;;  %v4622_v23 = vld [vmem:[%s6174_s3 + $0x200] sm:$0xff] }
 0x102   : > { %1507 = vmatmul.bf16.gmra.mxu0 %v663_v26  ;;  %v1569_v26 = vld [vmem:[#allocation2 + $0x24] sm:$0xff]  }
 0x103   : > { %1546 = vmatmul.bf16.gmra.mxu1 %v733_v27  ;;  %v5557_v27 = vld [vmem:[#allocation2 + $0x24] sm:$0xf0]  ;;  %2043 = vmatpush.bf16.msra.mxu0 %v4622_v23  ;;  %v737_v33 = vrot.slane %v4794_v22, 1  ;;  %v1660_v38 = vshll.u32 %v1569_v26, 16  ;;  %v1658_v41 = vshrl.u32 %v1569_v26, 16 }
 0x104   : > { %1971 = vmatmul.bf16.gmra.mxu2 %v1569_v26 }
 0x107   : > { %v1276_v39 = vpop.f32.mrf.mxu2  ;;  %v1200_v43 = vpop.f32.mrf.mxu0 }
 0x108   : > { %v1459_v40 = vpop.f32.mrf.mxu3  ;;  %v1277_v42 = vadd.f32 %v1276_v39, %v1238_v31  ;;  %v1239_v44 = vpop.f32.mrf.mxu1  ;;  %v686_v31 = vrot.slane %v684_v21, 1 }
 0x109   : > { %v1240_v50 = vadd.f32 %v1239_v44, %v1200_v43  ;;  %v1665_v43 = vshll.u32 %v5561_v37, 16 }
 0x10a   : > { %v5533_v52 = vadd.f32 %v1459_v40, %v1277_v42  ;;  %v1662_v42 = vrot.slane %v1660_v38, 1  ;;  %v687_v49 = vsel %vm627_vm0, %v5415_v29, %v686_v31  ;;  %v4809_v31 = vld [vmem:[#allocation2 + $0x18] sm:$0xf0] }
 0x10b   : > { %v1667_v56 = vrot.slane %v1665_v43, 1  ;;  %v5585_v43 = vld [vmem:[#allocation2 + $0x3c] sm:$0xf0] }
 0x10c   : > { %v1663_v35 = vor.u32 %v1662_v42, %v1658_v41  ;;  %v1573_v42 = vld [vmem:[#allocation2 + $0x3c] sm:$0xff]  }
 0x10d   : > { %v1684_v53 = vshll.u32 %v1573_v42, 16 }
 0x10e   : > { %v1668_v24 = vsel %vm627_vm0, %v1663_v35, %v1667_v56  ;;  %v1682_v35 = vshrl.u32 %v1573_v42, 16 }
 0x10f   : > { %v1278_v60 = vpop.f32.mrf.mxu2  ;;  %v1203_v45 = vpop.f32.mrf.mxu0  ;;  %2010 = vmatmul.bf16.gmra.mxu3 %v1668_v24  ;;  %v1686_v56 = vrot.slane %v1684_v53, 1  ;;  %v1584_v53 = vld [vmem:[#allocation2 + $0x5c] sm:$0x1] }
 0x110   : > { %v1461_v61 = vpop.f32.mrf.mxu3  ;;  %v1279_v0 = vadd.f32 %v1278_v60, %v1240_v50  ;;  %v1242_v2 = vpop.f32.mrf.mxu1  ;;  %v739_v50 = vsel %vm724_vm1, %v737_v33, %v738_v34  ;;  %v691_v60 = vshll.u32 %v5465_v15, 16  ;;  %v4810_v33 = vld [vmem:[#allocation2 + $0x18] sm:$0xe] }
 0x111   : > { %v1243_v5 = vadd.f32 %v1242_v2, %v1203_v45  ;;  %v4811_v41 = vor.u32 %v4810_v33, %v4809_v31 }
 0x112   : > { %v5549_v7 = vadd.f32 %v1461_v61, %v1279_v0  ;;  %1512 = vmatmul.bf16.gmra.mxu0 %v675_v46  ;;  %v693_v2 = vrot.slane %v691_v60, 1  ;;  %v696_v46 = vshll.u32 %v626_v58, 16 }
 0x113   : > { %1551 = vmatmul.bf16.gmra.mxu1 %v736_v3  ;;  %v4956_v3 = vor.u32 %v4955_v55, %v5467_v16 }
 0x114   : > { %v694_v9 = vor.u32 %v693_v2, %v689_v62  ;;  %v698_v10 = vrot.slane %v696_v46, 1  ;;  %1976 = vmatmul.bf16.gmra.mxu2 %v5393_v11  ;;  %v1742_v11 = vrot.slane %v5538_v59, 1 }
 0x115   : > { %v740_v12 = vrot.slane %v4956_v3, 1 }
 0x116   : > { %v699_v16 = vsel %vm627_vm0, %v694_v9, %v698_v10 }
 0x117   : > { %v1281_v13 = vpop.f32.mrf.mxu2  ;;  %v1205_v19 = vpop.f32.mrf.mxu0 }
 0x118   : > { %v1464_v14 = vpop.f32.mrf.mxu3  ;;  %v1282_v18 = vadd.f32 %v1281_v13, %v1243_v5  ;;  %v1244_v20 = vpop.f32.mrf.mxu1  ;;  %v741_v13 = vrot.slane %v626_v58, 1 }
 0x119   : > { %v1245_v51 = vadd.f32 %v1244_v20, %v1205_v19 }
 0x11a   : > { %v5559_v28 = vadd.f32 %v1464_v14, %v1282_v18  ;;  %v5575_v14 = vpack.c.b16 %v1635_v8, %v1635_v8  ;;  %v742_v23 = vsel %vm724_vm1, %v740_v12, %v741_v13  ;;  %v1583_v13 = vld [vmem:[#allocation2 + $0x50] sm:$0x1] }
 0x11c   : > { %v1677_v19 = vshll.u32 %v5575_v14, 16 }
 0x11f   : > { %v1283_v39 = vpop.f32.mrf.mxu2  ;;  %v1208_v47 = vpop.f32.mrf.mxu0 }
 0x120   : > { %v1466_v40 = vpop.f32.mrf.mxu3  ;;  %v1284_v44 = vadd.f32 %v1283_v39, %v1245_v51  ;;  %v1247_v48 = vpop.f32.mrf.mxu1  ;;  %v1679_v51 = vrot.slane %v1677_v19, 1  ;;  %v1745_v19 = vrot.slane %v5561_v37, 1  ;;  %v4812_v37 = vld [vmem:[#allocation2 + $0x30] sm:$0xf0] }
 0x121   : > { %v1248_v54 = vadd.f32 %v1247_v48, %v1208_v47  ;;  %v1582_v48 = vld [vmem:[#allocation2 + $0x44] sm:$0x1] }
 0x122   : > { %v5567_v57 = vadd.f32 %v1466_v40, %v1284_v44  ;;  %1517 = vmatmul.bf16.gmra.mxu0 %v687_v49  ;;  %v1680_v30 = vsel %vm627_vm0, %v5415_v29, %v1679_v51  ;;  %v1636_v49 = vunpack.c.l.b16 %v1582_v48  ;;  %v1741_v29 = vrot.slane %v4811_v41, 1  ;;  %v1577_v48 = vld [vmem:[#allocation2 + $0x54] sm:$0xff]  }
 0x123   : > { %1556 = vmatmul.bf16.gmra.mxu1 %v739_v50  ;;  %2015 = vmatmul.bf16.gmra.mxu3 %v1680_v30 }
 0x124   : > { %v5590_v50 = vpack.c.b16 %v1636_v49, %v1636_v49  ;;  %1981 = vmatmul.bf16.gmra.mxu2 %v1573_v42  ;;  %v4963_v49 = vld [vmem:[#allocation2 + $0x54] sm:$0xf0] }
 0x126   : > { %v1689_v24 = vshll.u32 %v5590_v50, 16 }
 0x127   : > { %v1286_v61 = vpop.f32.mrf.mxu2  ;;  %v1210_v0 = vpop.f32.mrf.mxu0 }
 0x128   : > { %v1469_v25 = vpop.f32.mrf.mxu3  ;;  %v1287_v63 = vadd.f32 %v1286_v61, %v1248_v54  ;;  %v1249_v45 = vpop.f32.mrf.mxu1 }
 0x129   : > { %v1250_v4 = vadd.f32 %v1249_v45, %v1210_v0  ;;  %v1687_v0 = vor.u32 %v1686_v56, %v1682_v35  ;;  %v1691_v45 = vrot.slane %v1689_v24, 1  ;;  %v1708_v35 = vshll.u32 %v1577_v48, 16 }
 0x12a   : > { %v5573_v5 = vadd.f32 %v1469_v25, %v1287_v63  ;;  %v1743_v25 = vsel %vm724_vm1, %v1741_v29, %v1742_v11  ;;  %v4958_v63 = vld [vmem:[#allocation2 + $0x24] sm:$0xe] }
 0x12b   : > { %v1692_v59 = vsel %vm627_vm0, %v1687_v0, %v1691_v45  ;;  %v4959_v9 = vor.u32 %v4958_v63, %v5557_v27  ;;  %v4961_v45 = vld [vmem:[#allocation2 + $0x3c] sm:$0xe] }
 0x12f   : > { %v1288_v18 = vpop.f32.mrf.mxu2  ;;  %v1213_v21 = vpop.f32.mrf.mxu0 }
 0x130   : > { %v1471_v15 = vpop.f32.mrf.mxu3  ;;  %v1289_v20 = vadd.f32 %v1288_v18, %v1250_v4  ;;  %v1252_v22 = vpop.f32.mrf.mxu1  ;;  %v1637_v18 = vunpack.c.l.b16 %v1583_v13 }
 0x131   : > { %v1253_v26 = vadd.f32 %v1252_v22, %v1213_v21 }
 0x132   : > { %v5580_v32 = vadd.f32 %v1471_v15, %v1289_v20  ;;  %1522 = vmatmul.bf16.gmra.mxu0 %v699_v16  ;;  %v1744_v15 = vrot.slane %v4959_v9, 1  ;;  %v5601_v20 = vpack.c.b16 %v1637_v18, %v1637_v18 }
 0x133   : > { %1561 = vmatmul.bf16.gmra.mxu1 %v742_v23  ;;  %2020 = vmatmul.bf16.gmra.mxu3 %v1692_v59 }
 0x134   : > { %v1701_v16 = vshll.u32 %v5601_v20, 16  ;;  %v1746_v30 = vsel %vm724_vm1, %v1744_v15, %v1745_v19  ;;  %1986 = vmatmul.bf16.gmra.mxu2 %v5448_v1  ;;  %v4815_v15 = vld [vmem:[#allocation2 + $0x48] sm:$0xf0]  ;;  %v4816_v19 = vld [vmem:[#allocation2 + $0x48] sm:$0xe] }
 0x136   : > { %v1703_v31 = vrot.slane %v1701_v16, 1 }
 0x137   : > { %v1291_v34 = vpop.f32.mrf.mxu2  ;;  %v1215_v39 = vpop.f32.mrf.mxu0 }
 0x138   : > { %v1474_v36 = vpop.f32.mrf.mxu3  ;;  %v1292_v38 = vadd.f32 %v1291_v34, %v1253_v26  ;;  %v1254_v40 = vpop.f32.mrf.mxu1  ;;  %v1704_v34 = vsel %vm627_vm0, %v5469_v17, %v1703_v31  ;;  %v1748_v17 = vrot.slane %v5575_v14, 1 }
 0x139   : > { %v1255_v44 = vadd.f32 %v1254_v40, %v1215_v39 }
 0x13a   : > { %v5587_v47 = vadd.f32 %v1474_v36, %v1292_v38  ;;  %v4813_v36 = vld [vmem:[#allocation2 + $0x30] sm:$0xe] }
 0x13f   : > { %v1293_v54 = vpop.f32.mrf.mxu2  ;;  %v1218_v60 = vpop.f32.mrf.mxu0 }
 0x140   : > { %v1476_v55 = vpop.f32.mrf.mxu3  ;;  %v1294_v58 = vadd.f32 %v1293_v54, %v1255_v44  ;;  %v1257_v61 = vpop.f32.mrf.mxu1  ;;  %v4814_v44 = vor.u32 %v4813_v36, %v4812_v37  ;;  %v1638_v54 = vunpack.c.l.b16 %v1584_v53 }
 0x141   : > { %v1258_v62 = vadd.f32 %v1257_v61, %v1218_v60  ;;  %v1710_v60 = vrot.slane %v1708_v35, 1 }
 0x142   : > { %v5594_v2 = vadd.f32 %v1476_v55, %v1294_v58  ;;  %2044 = vmatmul.bf16.vlgmr.msra.gmra.mxu0 %v1743_v25  ;;  %v1747_v55 = vrot.slane %v4814_v44, 1  ;;  %v1644_v1 = vpack.c.b16 %v1638_v54, %v1638_v54  ;;  %v1706_v58 = vshrl.u32 %v1577_v48, 16 }
 0x143   : > { %2025 = vmatmul.bf16.gmra.mxu3 %v1704_v34 }
 0x144   : > { %v1713_v61 = vshll.u32 %v1644_v1, 16  ;;  %v1749_v63 = vsel %vm724_vm1, %v1747_v55, %v1748_v17  ;;  %v1711_v59 = vor.u32 %v1710_v60, %v1706_v58  ;;  %1991 = vmatmul.bf16.gmra.mxu2 %v1577_v48  ;;  %v1757_v34 = vrot.slane %v1644_v1, 1 }
 0x147   : > { %v1296_v46 = vpop.f32.mrf.mxu2  ;;  %v1220_v6 = vpop.f32.mrf.mxu0 }
 0x148   : > { %v1479_v3 = vpop.f32.mrf.mxu3  ;;  %v1297_v4 = vadd.f32 %v1296_v46, %v1258_v62  ;;  %v1259_v8 = vpop.f32.mrf.mxu1  ;;  %v1715_v46 = vrot.slane %v1713_v61, 1 }
 0x149   : > { %v1260_v10 = vadd.f32 %v1259_v8, %v1220_v6  ;;  %v4962_v6 = vor.u32 %v4961_v45, %v5585_v43 }
 0x14a   : > { %v5598_v12 = vadd.f32 %v1479_v3, %v1297_v4  ;;  %v1716_v14 = vsel %vm627_vm0, %v1711_v59, %v1715_v46 }
 0x14b   : > { %v1750_v9 = vrot.slane %v4962_v6, 1 }
 0x14f   : > { %v1298_v21 = vpop.f32.mrf.mxu2  ;;  %v1223_v26 = vpop.f32.mrf.mxu0 }
 0x150   : > { %v1481_v22 = vpop.f32.mrf.mxu3  ;;  %v1299_v23 = vadd.f32 %v1298_v21, %v1260_v10  ;;  %v1262_v51 = vpop.f32.mrf.mxu1  ;;  %v1751_v10 = vrot.slane %v5590_v50, 1 }
 0x151   : > { %v1263_v27 = vadd.f32 %v1262_v51, %v1223_v26  ;;  %v4964_v51 = vld [vmem:[#allocation2 + $0x54] sm:$0xe] }
 0x152   : > { %v5605_v33 = vadd.f32 %v1481_v22, %v1299_v23  ;;  %2049 = vmatmul.bf16.gmra.mxu0 %v1746_v30  ;;  %v4817_v22 = vor.u32 %v4816_v19, %v4815_v15  ;;  %v4965_v30 = vor.u32 %v4964_v51, %v4963_v49 }
 0x153   : > { %2030 = vmatmul.bf16.gmra.mxu3 %v1716_v14 }
 0x154   : > { %v1753_v43 = vrot.slane %v4817_v22, 1  ;;  %v1756_v31 = vrot.slane %v4965_v30, 1 }
 0x156   : > { %v1758_v37 = vsel %vm724_vm1, %v1756_v31, %v1757_v34 }
 0x157   : > { %v1301_v38 = vpop.f32.mrf.mxu2  ;;  %v1225_v41 = vpop.f32.mrf.mxu0 }
 0x158   : > { %v1484_v39 = vpop.f32.mrf.mxu3  ;;  %v1302_v40 = vadd.f32 %v1301_v38, %v1263_v27  ;;  %v1264_v42 = vpop.f32.mrf.mxu1 }
 0x159   : > { %v1265_v29 = vadd.f32 %v1264_v42, %v1225_v41 }
 0x15a   : > { %v5610_v11 = vadd.f32 %v1484_v39, %v1302_v40 }
 0x15f   : > { %v1303_v56 = vpop.f32.mrf.mxu2  ;;  %v1498_v62 = vpop.f32.mrf.mxu0 }
 0x160   : > { %v1486_v24 = vpop.f32.mrf.mxu3  ;;  %v1304_v25 = vadd.f32 %v1303_v56, %v1265_v29  ;;  %v1499_v0 = vadd.f32 %v1498_v62, %v5533_v52  ;;  %v1752_v52 = vsel %vm724_vm1, %v1750_v9, %v1751_v10  ;;  %v1537_v41 = vpop.f32.mrf.mxu1 }
 0x162   : > { %v1487_v3 = vadd.f32 %v1486_v24, %v1304_v25  ;;  %2054 = vmatmul.bf16.gmra.mxu0 %v1749_v63  ;;  %v1538_v56 = vadd.f32 %v1537_v41, %v1499_v0 }
 0x167   : > { %v1500_v4 = vpop.f32.mrf.mxu0  ;;  %v1967_v40 = vpop.f32.mrf.mxu2 }
 0x168   : > { %v1501_v8 = vadd.f32 %v1500_v4, %v5549_v7  ;;  %v1754_v7 = vrot.slane %v5601_v20, 1  ;;  %v1539_v53 = vpop.f32.mrf.mxu1 }
 0x16a   : > { %v1755_v50 = vsel %vm724_vm1, %v1753_v43, %v1754_v7  ;;  %v1540_v45 = vadd.f32 %v1539_v53, %v1501_v8 }
 0x16f   : > { %v1503_v13 = vpop.f32.mrf.mxu0  ;;  %v1969_v48 = vpop.f32.mrf.mxu2 }
 0x170   : > { %v5621_v18 = vadd.f32 %v1503_v13, %v5559_v28  ;;  %v1542_v17 = vpop.f32.mrf.mxu1 }
 0x172   : > { %2059 = vmatmul.bf16.gmra.mxu0 %v1752_v52  ;;  %v1543_v15 = vadd.f32 %v1542_v17, %v5621_v18 }
 0x177   : > { %v1505_v21 = vpop.f32.mrf.mxu0 }
 0x178   : > { %v5624_v16 = vadd.f32 %v1505_v21, %v5567_v57  ;;  %v1544_v61 = vpop.f32.mrf.mxu1 }
 0x17a   : > { %v1545_v18 = vadd.f32 %v1544_v61, %v5624_v16 }
 0x17f   : > { %v1508_v23 = vpop.f32.mrf.mxu0 }
 0x180   : > { %v5629_v26 = vadd.f32 %v1508_v23, %v5573_v5  ;;  %v1547_v13 = vpop.f32.mrf.mxu1 }
 0x182   : > { %2064 = vmatmul.bf16.gmra.mxu0 %v1755_v50 }
 0x187   : > { %v1510_v28 = vpop.f32.mrf.mxu0  ;;  %v1972_v55 = vpop.f32.mrf.mxu2 }
 0x188   : > { %v5632_v27 = vadd.f32 %v1510_v28, %v5580_v32  ;;  %v2006_v32 = vpop.f32.mrf.mxu3 }
 0x189   : > { %v2007_v1 = vadd.f32 %v2006_v32, %v1967_v40 }
 0x18f   : > { %v1513_v57 = vpop.f32.mrf.mxu0  ;;  %v1974_v60 = vpop.f32.mrf.mxu2 }
 0x190   : > { %v5636_v20 = vadd.f32 %v1513_v57, %v5587_v47  ;;  %v2008_v47 = vpop.f32.mrf.mxu3 }
 0x191   : > { %v2009_v25 = vadd.f32 %v2008_v47, %v1969_v48 }
 0x192   : > { %2069 = vmatmul.bf16.gmra.mxu0 %v1758_v37 }
 0x197   : > { %v1515_v36 = vpop.f32.mrf.mxu0  ;;  %v1977_v4 = vpop.f32.mrf.mxu2 }
 0x198   : > { %v5639_v5 = vadd.f32 %v1515_v36, %v5594_v2 }
 0x19f   : > { %v1518_v38 = vpop.f32.mrf.mxu0  ;;  %v1979_v28 = vpop.f32.mrf.mxu2 }
 0x1a0   : > { %v5642_v39 = vadd.f32 %v1518_v38, %v5598_v12  ;;  %v2011_v12 = vpop.f32.mrf.mxu3  ;;  %v1549_v38 = vpop.f32.mrf.mxu1 }
 0x1a1   : > { %v2012_v14 = vadd.f32 %v2011_v12, %v1972_v55 }
 0x1a7   : > { %v1520_v42 = vpop.f32.mrf.mxu0 }
 0x1a8   : > { %v5645_v44 = vadd.f32 %v1520_v42, %v5605_v33  ;;  %v5655_v33 = vld [vmem:[%s6175_s4] ss:$0 sm:$0xff] }
 0x1af   : > { %v1523_v49 = vpop.f32.mrf.mxu0 }
 0x1b0   : > { %v5648_v29 = vadd.f32 %v1523_v49, %v5610_v11  ;;  %v2013_v11 = vpop.f32.mrf.mxu3 }
 0x1b1   : > { %v2014_v50 = vadd.f32 %v2013_v11, %v1974_v60  ;;  %v1982_v11 = vpop.f32.mrf.mxu2 }
 0x1b7   : > { %v1525_v2 = vpop.f32.mrf.mxu0 }
 0x1b8   : > { %v5650_v54 = vadd.f32 %v1525_v2, %v1487_v3  ;;  %v2016_v6 = vpop.f32.mrf.mxu3 }
 0x1b9   : > { %v2017_v47 = vadd.f32 %v2016_v6, %v1977_v4  ;;  %v1550_v4 = vadd.f32 %v1549_v38, %v5632_v27 }
 0x1bf   : > { %v2045_v35 = vpop.f32.mrf.mxu0 }
 0x1c0   : > { %v2046_v24 = vadd.f32 %v2045_v35, %v2007_v1  ;;  %v2018_v34 = vpop.f32.mrf.mxu3 }
 0x1c2   : > { %v2075_v58 = vadd.f32 %v2046_v24, %v1538_v56  ;;  %v1548_v24 = vadd.f32 %v1547_v13, %v5629_v26 }
 0x1c4   : > { %v2091_v62 = vadd.f32 %v5655_v33, %v2075_v58 }
 0x1c6   : > { %v2103_v46 = vmax.f32 %v2091_v62, 0.0 }
 0x1c7   : > { %v2047_v63 = vpop.f32.mrf.mxu0 }
 0x1c8   : > { %v2048_v59 = vadd.f32 %v2047_v63, %v2009_v25  ;;  %v2115_v9 = vpack.c.bf16 %v2103_v46, %v2103_v46  ;;  %v2021_v61 = vpop.f32.mrf.mxu3 }
 0x1ca   : > { %v2076_v3 = vadd.f32 %v2048_v59, %v1540_v45  ;;  %v2139_v22 = vunpack.c.l.b16 %v2115_v9  ;;  %v1552_v45 = vpop.f32.mrf.mxu1 }
 0x1cc   : > { %v2092_v0 = vadd.f32 %v5655_v33, %v2076_v3  ;;  %v2019_v3 = vadd.f32 %v2018_v34, %v1979_v28 }
 0x1ce   : > { %v2104_v10 = vmax.f32 %v2092_v0, 0.0 }
 0x1cf   : > { %v2050_v52 = vpop.f32.mrf.mxu0 }
 0x1d0   : > { %v2116_v19 = vpack.c.bf16 %v2104_v10, %v2104_v10  ;;  %v2051_v21 = vadd.f32 %v2050_v52, %v2012_v14 }
 0x1d2   : > { %v2140_v43 = vunpack.c.l.b16 %v2116_v19  ;;  %v2077_v7 = vadd.f32 %v2051_v21, %v1543_v15  ;;  %v1984_v19 = vpop.f32.mrf.mxu2 }
 0x1d4   : > { %v2151_v8 = vpack.c.b16 %v2140_v43, %v2139_v22  ;;  %v2093_v51 = vadd.f32 %v5655_v33, %v2077_v7  ;;  %v2023_v22 = vpop.f32.mrf.mxu3  ;;  %v2022_v7 = vadd.f32 %v2021_v61, %v1982_v11 }
 0x1d6   : > { %v2158_v23 = vshrl.u32 %v2151_v8, 16  ;;  %v2161_v37 = vshll.u32 %v2151_v8, 16  ;;  %v2105_v41 = vmax.f32 %v2093_v51, 0.0 }
 0x1d7   : > { %v2052_v31 = vpop.f32.mrf.mxu0 }
 0x1d8   : > { %v2160_v57 = vrot.slane %v2158_v23, 7  ;;  %v2053_v36 = vadd.f32 %v2052_v31, %v2014_v50  ;;  %v2117_v12 = vpack.c.bf16 %v2105_v41, %v2105_v41  ;;  %v1554_v23 = vpop.f32.mrf.mxu1 }
 0x1da   : > { %v2163_v40 = vor.u32 %v2161_v37, %v2160_v57  ;;  %v2220_v32 = vsel %vm5661_vm4, %v2160_v57, 0  ;;  %v2078_v42 = vadd.f32 %v2053_v36, %v1545_v18  ;;  %v2141_v25 = vunpack.c.l.b16 %v2117_v12 }
 0x1db   : > { %v2240_v48 = vunpack.c.l.b16 %v2220_v32  ;;  %v1553_v37 = vadd.f32 %v1552_v45, %v5636_v20  ;;  %v1555_v12 = vadd.f32 %v1554_v23, %v5639_v5 }
 0x1dc   : > { %v2214_v49 = vsel %vm5661_vm4, 0, %v2163_v40  ;;  %v2094_v53 = vadd.f32 %v5655_v33, %v2078_v42 }
 0x1dd   : > { %v2238_v2 = vunpack.c.l.b16 %v2214_v49  ;;  %v2239_v55 = vunpack.c.h.b16 %v2214_v49  ;;  %v2258_v16 = vpack.c.b16 %v2240_v48, %v2240_v48  ;;  %v1987_v48 = vpop.f32.mrf.mxu2  ;;  %v2026_v49 = vpop.f32.mrf.mxu3 }
 0x1de   : > { %v2106_v17 = vmax.f32 %v2094_v53, 0.0  ;;  %v2024_v53 = vadd.f32 %v2023_v22, %v1984_v19  ;;  %v2027_v61 = vadd.f32 %v2026_v49, %v1987_v48 }
 0x1df   : > { %v2256_v1 = vpack.c.b16 %v2238_v2, %v2238_v2  ;;  %v2257_v35 = vpack.c.b16 %v2239_v55, %v2239_v55  ;;  %2294 = vst [vmem:[#allocation3 + $0x8] sm:$0x1] %v2258_v16  ;;  %v2055_v56 = vpop.f32.mrf.mxu0 }
 0x1e0   : > { %v2118_v58 = vpack.c.bf16 %v2106_v17, %v2106_v17  ;;  %v2056_v60 = vadd.f32 %v2055_v56, %v2017_v47  ;;  %v1557_v55 = vpop.f32.mrf.mxu1 }
 0x1e1   : > { %2292 = vst [vmem:[#allocation3] sm:$0xf] %v2256_v1 }
 0x1e2   : > { %2293 = vst [vmem:[#allocation3 + $0x4] sm:$0xf] %v2257_v35  ;;  %v2142_v62 = vunpack.c.l.b16 %v2118_v58  ;;  %v2079_v63 = vadd.f32 %v2056_v60, %v1548_v24 }
 0x1e4   : > { %v2152_v59 = vpack.c.b16 %v2142_v62, %v2141_v25  ;;  %v2095_v14 = vadd.f32 %v5655_v33, %v2079_v63 }
 0x1e6   : > { %v2165_v46 = vshrl.u32 %v2152_v59, 16  ;;  %v2168_v26 = vshll.u32 %v2152_v59, 16  ;;  %v2107_v52 = vmax.f32 %v2095_v14, 0.0 }
 0x1e7   : > { %v2057_v0 = vpop.f32.mrf.mxu0 }
 0x1e8   : > { %v2167_v6 = vrot.slane %v2165_v46, 7  ;;  %v2058_v9 = vadd.f32 %v2057_v0, %v2019_v3  ;;  %v2119_v28 = vpack.c.bf16 %v2107_v52, %v2107_v52  ;;  %v1989_v46 = vpop.f32.mrf.mxu2  ;;  %v2028_v0 = vpop.f32.mrf.mxu3 }
 0x1e9   : > { %v2029_v22 = vadd.f32 %v2028_v0, %v1989_v46 }
 0x1ea   : > { %v2170_v10 = vor.u32 %v2168_v26, %v2167_v6  ;;  %v2221_v13 = vsel %vm5661_vm4, %v2167_v6, 0  ;;  %v2080_v15 = vadd.f32 %v2058_v9, %v1550_v4  ;;  %v2143_v40 = vunpack.c.l.b16 %v2119_v28 }
 0x1eb   : > { %v2243_v21 = vunpack.c.l.b16 %v2221_v13  ;;  %v1558_v6 = vadd.f32 %v1557_v55, %v5642_v39 }
 0x1ec   : > { %v2215_v43 = vsel %vm5661_vm4, 0, %v2170_v10  ;;  %v2096_v8 = vadd.f32 %v5655_v33, %v2080_v15  ;;  %v1559_v10 = vpop.f32.mrf.mxu1 }
 0x1ed   : > { %v2241_v27 = vunpack.c.l.b16 %v2215_v43  ;;  %v2242_v50 = vunpack.c.h.b16 %v2215_v43  ;;  %v2261_v51 = vpack.c.b16 %v2243_v21, %v2243_v21 }
 0x1ee   : > { %v2108_v31 = vmax.f32 %v2096_v8, 0.0  ;;  %v1560_v8 = vadd.f32 %v1559_v10, %v5645_v44 }
 0x1ef   : > { %v2259_v34 = vpack.c.b16 %v2241_v27, %v2241_v27  ;;  %v2260_v18 = vpack.c.b16 %v2242_v50, %v2242_v50  ;;  %2297 = vst [vmem:[#allocation3 + $0x14] sm:$0x1] %v2261_v51  ;;  %v2060_v57 = vpop.f32.mrf.mxu0 }
 0x1f0   : > { %v2120_v36 = vpack.c.bf16 %v2108_v31, %v2108_v31  ;;  %v2061_v38 = vadd.f32 %v2060_v57, %v2022_v7  ;;  %v1992_v39 = vpop.f32.mrf.mxu2  ;;  %v2031_v51 = vpop.f32.mrf.mxu3 }
 0x1f1   : > { %2295 = vst [vmem:[#allocation3 + $0xc] sm:$0xf] %v2259_v34 }
 0x1f2   : > { %2296 = vst [vmem:[#allocation3 + $0x10] sm:$0xf] %v2260_v18  ;;  %v2144_v32 = vunpack.c.l.b16 %v2120_v36  ;;  %v2081_v41 = vadd.f32 %v2061_v38, %v1553_v37  ;;  %v2032_v38 = vadd.f32 %v2031_v51, %v1992_v39 }
 0x1f4   : > { %v2153_v42 = vpack.c.b16 %v2144_v32, %v2143_v40  ;;  %v2097_v2 = vadd.f32 %v5655_v33, %v2081_v41  ;;  %v1562_v57 = vpop.f32.mrf.mxu1 }
 0x1f6   : > { %v2172_v47 = vshrl.u32 %v2153_v42, 16  ;;  %v2175_v20 = vshll.u32 %v2153_v42, 16  ;;  %v2109_v24 = vmax.f32 %v2097_v2, 0.0  ;;  %v1563_v2 = vadd.f32 %v1562_v57, %v5648_v29 }
 0x1f7   : > { %v2062_v16 = vpop.f32.mrf.mxu0 }
 0x1f8   : > { %v2174_v17 = vrot.slane %v2172_v47, 7  ;;  %v2063_v1 = vadd.f32 %v2062_v16, %v2024_v53  ;;  %v2121_v5 = vpack.c.bf16 %v2109_v24, %v2109_v24 }
 0x1fa   : > { %v2177_v35 = vor.u32 %v2175_v20, %v2174_v17  ;;  %v2222_v56 = vsel %vm5661_vm4, %v2174_v17, 0  ;;  %v2082_v58 = vadd.f32 %v2063_v1, %v1555_v12  ;;  %v2145_v13 = vunpack.c.l.b16 %v2121_v5  ;;  %v1994_v1 = vpop.f32.mrf.mxu2 }
 0x1fb   : > { %v2246_v60 = vunpack.c.l.b16 %v2222_v56 }
 0x1fc   : > { %v2216_v11 = vsel %vm5661_vm4, 0, %v2177_v35  ;;  %v2098_v25 = vadd.f32 %v5655_v33, %v2082_v58  ;;  %v2033_v35 = vpop.f32.mrf.mxu3  ;;  %v1564_v24 = vpop.f32.mrf.mxu1 }
 0x1fd   : > { %v2244_v62 = vunpack.c.l.b16 %v2216_v11  ;;  %v2245_v63 = vunpack.c.h.b16 %v2216_v11  ;;  %v2264_v45 = vpack.c.b16 %v2246_v60, %v2246_v60  ;;  %v2034_v60 = vadd.f32 %v2033_v35, %v1994_v1 }
 0x1fe   : > { %v2110_v59 = vmax.f32 %v2098_v25, 0.0  ;;  %v1565_v25 = vadd.f32 %v1564_v24, %v5650_v54 }
 0x1ff   : > { %v2262_v3 = vpack.c.b16 %v2244_v62, %v2244_v62  ;;  %v2263_v14 = vpack.c.b16 %v2245_v63, %v2245_v63  ;;  %2300 = vst [vmem:[#allocation3 + $0x20] sm:$0x1] %v2264_v45  ;;  %v2065_v4 = vpop.f32.mrf.mxu0 }
 0x200   : > { %v2122_v26 = vpack.c.bf16 %v2110_v59, %v2110_v59  ;;  %v2066_v9 = vadd.f32 %v2065_v4, %v2027_v61 }
 0x201   : > { %2298 = vst [vmem:[#allocation3 + $0x18] sm:$0xf] %v2262_v3 }
 0x202   : > { %2299 = vst [vmem:[#allocation3 + $0x1c] sm:$0xf] %v2263_v14  ;;  %v2146_v52 = vunpack.c.l.b16 %v2122_v26  ;;  %v2083_v15 = vadd.f32 %v2066_v9, %v1558_v6 }
 0x204   : > { %v2154_v19 = vpack.c.b16 %v2146_v52, %v2145_v13  ;;  %v2099_v43 = vadd.f32 %v5655_v33, %v2083_v15 }
 0x206   : > { %v2179_v21 = vshrl.u32 %v2154_v19, 16  ;;  %v2182_v27 = vshll.u32 %v2154_v19, 16  ;;  %v2111_v34 = vmax.f32 %v2099_v43, 0.0 }
 0x207   : > { %v2067_v7 = vpop.f32.mrf.mxu0 }
 0x208   : > { %v2181_v23 = vrot.slane %v2179_v21, 7  ;;  %v2068_v50 = vadd.f32 %v2067_v7, %v2029_v22  ;;  %v2123_v42 = vpack.c.bf16 %v2111_v34, %v2111_v34 }
 0x20a   : > { %v2184_v28 = vor.u32 %v2182_v27, %v2181_v23  ;;  %v2223_v31 = vsel %vm5661_vm4, %v2181_v23, 0  ;;  %v2084_v18 = vadd.f32 %v2068_v50, %v1560_v8  ;;  %v2147_v12 = vunpack.c.l.b16 %v2123_v42 }
 0x20b   : > { %v2249_v37 = vunpack.c.l.b16 %v2223_v31 }
 0x20c   : > { %v2217_v36 = vsel %vm5661_vm4, 0, %v2184_v28  ;;  %v2100_v40 = vadd.f32 %v5655_v33, %v2084_v18 }
 0x20d   : > { %v2247_v44 = vunpack.c.l.b16 %v2217_v36  ;;  %v2248_v32 = vunpack.c.h.b16 %v2217_v36  ;;  %v2267_v41 = vpack.c.b16 %v2249_v37, %v2249_v37 }
 0x20e   : > { %v2112_v48 = vmax.f32 %v2100_v40, 0.0 }
 0x20f   : > { %v2265_v49 = vpack.c.b16 %v2247_v44, %v2247_v44  ;;  %v2266_v47 = vpack.c.b16 %v2248_v32, %v2248_v32  ;;  %2303 = vst [vmem:[#allocation3 + $0x2c] sm:$0x1] %v2267_v41  ;;  %v2070_v53 = vpop.f32.mrf.mxu0 }
 0x210   : > { %v2124_v55 = vpack.c.bf16 %v2112_v48, %v2112_v48  ;;  %v2071_v16 = vadd.f32 %v2070_v53, %v2032_v38 }
 0x211   : > { %2301 = vst [vmem:[#allocation3 + $0x24] sm:$0xf] %v2265_v49 }
 0x212   : > { %2302 = vst [vmem:[#allocation3 + $0x28] sm:$0xf] %v2266_v47  ;;  %v2148_v17 = vunpack.c.l.b16 %v2124_v55  ;;  %v2085_v20 = vadd.f32 %v2071_v16, %v1563_v2 }
 0x214   : > { %v2155_v56 = vpack.c.b16 %v2148_v17, %v2147_v12  ;;  %v2101_v11 = vadd.f32 %v5655_v33, %v2085_v20 }
 0x216   : > { %v2186_v58 = vshrl.u32 %v2155_v56, 16  ;;  %v2189_v29 = vshll.u32 %v2155_v56, 16  ;;  %v2113_v59 = vmax.f32 %v2101_v11, 0.0 }
 0x217   : > { %v2072_v61 = vpop.f32.mrf.mxu0 }
 0x218   : > { %v2188_v62 = vrot.slane %v2186_v58, 7  ;;  %v2073_v63 = vadd.f32 %v2072_v61, %v2034_v60  ;;  %v2125_v9 = vpack.c.bf16 %v2113_v59, %v2113_v59 }
 0x21a   : > { %v2191_v45 = vor.u32 %v2189_v29, %v2188_v62  ;;  %v2224_v5 = vsel %vm5661_vm4, %v2188_v62, 0  ;;  %v2086_v46 = vadd.f32 %v2073_v63, %v1565_v25  ;;  %v2149_v15 = vunpack.c.l.b16 %v2125_v9 }
 0x21b   : > { %v2252_v3 = vunpack.c.l.b16 %v2224_v5 }
 0x21c   : > { %v2218_v14 = vsel %vm5661_vm4, 0, %v2191_v45  ;;  %v2102_v0 = vadd.f32 %v5655_v33, %v2086_v46 }
 0x21d   : > { %v2250_v4 = vunpack.c.l.b16 %v2218_v14  ;;  %v2251_v6 = vunpack.c.h.b16 %v2218_v14  ;;  %v2270_v26 = vpack.c.b16 %v2252_v3, %v2252_v3 }
 0x21e   : > { %v2114_v54 = vmax.f32 %v2102_v0, 0.0 }
 0x21f   : > { %v2268_v10 = vpack.c.b16 %v2250_v4, %v2250_v4  ;;  %v2269_v13 = vpack.c.b16 %v2251_v6, %v2251_v6  ;;  %2306 = vst [vmem:[#allocation3 + $0x38] sm:$0x1] %v2270_v26 }
 0x220   : > { %v2126_v52 = vpack.c.bf16 %v2114_v54, %v2114_v54 }
 0x221   : > { %2304 = vst [vmem:[#allocation3 + $0x30] sm:$0xf] %v2268_v10 }
 0x222   : > { %2305 = vst [vmem:[#allocation3 + $0x34] sm:$0xf] %v2269_v13  ;;  %v2150_v19 = vunpack.c.l.b16 %v2126_v52 }
 0x224   : > { %v2156_v21 = vpack.c.b16 %v2150_v19, %v2149_v15 }
 0x226   : > { %v2193_v22 = vshrl.u32 %v2156_v21, 16  ;;  %v2196_v7 = vshll.u32 %v2156_v21, 16 }
 0x228   : > { %v2195_v43 = vrot.slane %v2193_v22, 7 }
 0x22a   : > { %v2198_v8 = vor.u32 %v2196_v7, %v2195_v43  ;;  %v2225_v33 = vsel %vm5661_vm4, %v2195_v43, 0 }
 0x22b   : > { %v2255_v23 = vunpack.c.l.b16 %v2225_v33 }
 0x22c   : > { %v2219_v27 = vsel %vm5661_vm4, 0, %v2198_v8 }
 0x22d   : > { %v2253_v50 = vunpack.c.l.b16 %v2219_v27  ;;  %v2254_v39 = vunpack.c.h.b16 %v2219_v27  ;;  %v2273_v51 = vpack.c.b16 %v2255_v23, %v2255_v23 }
 0x22e   : > { %2312 = sbr.rel (%p3771_p5) target bundleno = 567 (0x237), region = 68 }
 0x22f   : > { %v2271_v28 = vpack.c.b16 %v2253_v50, %v2253_v50  ;;  %v2272_v31 = vpack.c.b16 %v2254_v39, %v2254_v39  ;;  %2309 = vst [vmem:[#allocation3 + $0x44] sm:$0x1] %v2273_v51 }
 0x231   : > { %2307 = vst [vmem:[#allocation3 + $0x3c] sm:$0xf] %v2271_v28 }
 0x232   : > { %2308 = vst [vmem:[#allocation3 + $0x40] sm:$0xf] %v2272_v31 }
 0x233   : > { %v5082_v34 = vmov 0  }
 0x234   : > { %2313 = vst [vmem:[#allocation3] sm:$0xf] %v5082_v34 }
 0x235   : > { %2314 = vst [vmem:[#allocation3 + $0x4] sm:$0xf] %v5082_v34 }
 0x236   : > { %2315 = vst [vmem:[#allocation3 + $0x8] sm:$0x1] %v5082_v34 }
 0x237 PF: > { %2318 = sbr.rel (%p3773_p7) target bundleno = 576 (0x240), region = 72 }
 0x23c   : > { %v5083_v30 = vmov 0  }
 0x23d   : > { %2320 = vst [vmem:[#allocation3 + $0x3c] sm:$0xf] %v5083_v30 }
 0x23e   : > { %2321 = vst [vmem:[#allocation3 + $0x40] sm:$0xf] %v5083_v30 }
 0x23f   : > { %2322 = vst [vmem:[#allocation3 + $0x44] sm:$0x1] %v5083_v30 }
 0x240 PF: > { %v4661_v18 = vld [vmem:[%s6176_s5 + $0xf8] sm:$0xff]  ;;  %v4660_v37 = vld [vmem:[%s6176_s5 + $0xf0] sm:$0xff]  ;;  %v4659_v38 = vld [vmem:[%s6176_s5 + $0xe8] sm:$0xff]  ;;  %s4702_s18 = sshll.u32 %s5062_s27, 3  ;;  %s4548_s30 = sshll.u32 %s5066_s28, 5 }
 0x241   : > { %v4669_v57 = vld [vmem:[%s6176_s5 + $0x138] sm:$0xff]  ;;  %2829 = vmatpush.bf16.msra.mxu1 %v4661_v18  ;;  %4840 = vmatpush.bf16.msra.mxu3 %v4661_v18  ;;  %v4668_v36 = vld [vmem:[%s6176_s5 + $0x130] sm:$0xff]  ;;  %v4667_v40 = vld [vmem:[%s6176_s5 + $0x128] sm:$0xff]  ;;  %s3617_s0 = sadd.s32 %s4702_s18, %s4548_s30  ;;  %s3620_s22 = sshll.u32 %s5237_s11, 4  ;;  %s3621_s22 = int_to_ptr.vmem [resolvable:$true] %s3620_s22 }
 0x242   : > { %2858 = vmatpush.bf16.msra.mxu2 %v4669_v57  ;;  %v4685_v44 = vld [vmem:[%s6176_s5 + $0x1b8] sm:$0xff]  ;;  %v5732_v32 = vld [vmem:[#allocation3 + $0xc] sm:$0xff]   ;;  %v4658_v48 = vld [vmem:[%s6176_s5 + $0xe0] sm:$0xff]  ;;  %s4549_s29 = sshll.u32 %s3617_s0, 3  ;;  %s6195_s12 = sand.u32 1, %s5054_s25  }
 0x243   : > { %v5734_v41 = vld [vmem:[#allocation3 + $0xc] sm:$0xf0]  ;;  %3473 = vmatpush.bf16.msrb.mxu0 %v4685_v44  ;;  %v4666_v49 = vld [vmem:[%s6176_s5 + $0x120] sm:$0xff]  ;;  %v2512_v47 = vld [vmem:[#allocation3 + $0x14] sm:$0x1]  ;;  %v2559_v35 = vshll.u32 %v5732_v32, 16  ;;  %s3619_s19 = scalar_lea.hbm %s6178_s7, %s4549_s29 }
 0x244   : > { %v4684_v42 = vld [vmem:[%s6176_s5 + $0x1b0] sm:$0xff]  ;;  %v4683_v53 = vld [vmem:[%s6176_s5 + $0x1a8] sm:$0xff]  ;;  %v4657_v2 = vld [vmem:[%s6176_s5 + $0xd8] sm:$0xff]  ;;  %v2548_v16 = vunpack.c.l.b16 %v2512_v47  ;;  %v2557_v61 = vshrl.u32 %v5732_v32, 16  ;;  %s3622_s9 = sshll.u32 %s3619_s19, 4  ;;  %s3605_s21 = scalar_lea.sflag [#allocation5], %s6195_s12  ;;  %s3623_s9 = int_to_ptr.hbm [resolvable:$true] %s3622_s9 }
 0x245   : > { %2830 = vmatpush.bf16.msra.mxu1 %v4660_v37  ;;  %4841 = vmatpush.bf16.msra.mxu3 %v4660_v37  ;;  %v4665_v55 = vld [vmem:[%s6176_s5 + $0x118] sm:$0xff]  ;;  %v4682_v12 = vld [vmem:[%s6176_s5 + $0x1a0] sm:$0xff]  ;;  %v4656_v17 = vld [vmem:[%s6176_s5 + $0xd0] sm:$0xff]  ;;  %v2561_v25 = vrot.slane %v2559_v35, 1  ;;  %s4998_s23 = sshra.s32 %s3623_s9, 4  ;;  %s5004_s17 = scalar_lea.hbm %s6178_s7, 512  ;;  %s4999_s23 = int_to_ptr.hbm [resolvable:$true] %s4998_s23 }
 0x246   : > { %2859 = vmatpush.bf16.msra.mxu2 %v4668_v36  ;;  %v4664_v20 = vld [vmem:[%s6176_s5 + $0x110] sm:$0xff]  ;;  %v5763_v1 = vpack.c.b16 %v2548_v16, %v2548_v16  ;;  %v4681_v56 = vld [vmem:[%s6176_s5 + $0x198] sm:$0xff]  ;;  %v4655_v24 = vld [vmem:[%s6176_s5 + $0xc8] sm:$0xff]  ;;  %s5000_s10 = scalar_lea.hbm %s4999_s23, 64  ;;  %p5005_p13 = scmp.lt.s32.totalorder %s4999_s23, %s6178_s7 }
 0x247   : > { %3474 = vmatpush.bf16.msrb.mxu0 %v4684_v42  ;;  %v5772_v58 = vld [vmem:[#allocation3 + $0x24] sm:$0xff]   ;;  %v4680_v29 = vld [vmem:[%s6176_s5 + $0x190] sm:$0xff]  ;;  %v2562_v5 = vor.u32 %v2561_v25, %v2557_v61  ;;  %v4677_v46 = vld [vmem:[%s6176_s5 + $0x178] sm:$0xff]  ;;  %p5001_p10 = scmp.ne.s32.totalorder %s4999_s23, %s5000_s10  ;;  %p5006_p0 = scmp.lt.s32.totalorder %s5004_s17, %s5000_s10 }
 0x248   : > { %v5774_v60 = vld [vmem:[#allocation3 + $0x24] sm:$0xf0]  ;;  %v2564_v62 = vshll.u32 %v5763_v1, 16  ;;  %v4654_v63 = vld [vmem:[%s6176_s5 + $0xc0] sm:$0xff]  ;;  %v4645_v3 = vld [vmem:[%s6176_s5 + $0x78] sm:$0xff]  ;;  %v2583_v47 = vshll.u32 %v5772_v58, 16 }
 0x249   : > { %2831 = vmatpush.bf16.msra.mxu1 %v4659_v38  ;;  %4842 = vmatpush.bf16.msra.mxu3 %v4659_v38  ;;  %v4663_v11 = vld [vmem:[%s6176_s5 + $0x108] sm:$0xff]  ;;  %v4662_v45 = vld [vmem:[%s6176_s5 + $0x100] sm:$0xff]  ;;  %v4637_v14 = vld [vmem:[%s6176_s5 + $0x38] sm:$0xff]  ;;  %p5002_p11 = pnand %p5001_p10, %p5177_p3  ;;  %p5007_p1 = por %p5006_p0, %p5005_p13 }
 0x24a   : > { %2860 = vmatpush.bf16.msra.mxu2 %v4667_v40  ;;  %v2566_v59 = vrot.slane %v2564_v62, 1  ;;  %v2513_v0 = vld [vmem:[#allocation3 + $0x20] sm:$0x1]  ;;  %v4679_v4 = vld [vmem:[%s6176_s5 + $0x188] sm:$0xff]  ;;  %v4676_v26 = vld [vmem:[%s6176_s5 + $0x170] sm:$0xff] }
 0x24b   : > { %3475 = vmatpush.bf16.msrb.mxu0 %v4683_v53  ;;  %v2549_v9 = vunpack.c.l.b16 %v2513_v0  ;;  %v4636_v54 = vld [vmem:[%s6176_s5 + $0x30] sm:$0xff]  ;;  %v5812_v13 = vld [vmem:[#allocation3 + $0x18] sm:$0xff]   ;;  %v4678_v52 = vld [vmem:[%s6176_s5 + $0x180] sm:$0xff]  ;;  %p5003_p12 = pneg %p5002_p11 }
 0x24c   : > { %v2567_v6 = vsel %vm627_vm0, %v2562_v5, %v2566_v59  ;;  %v4644_v10 = vld [vmem:[%s6176_s5 + $0x70] sm:$0xff]  ;;  %v4675_v15 = vld [vmem:[%s6176_s5 + $0x168] sm:$0xff]  ;;  %v2571_v19 = vshll.u32 %v5812_v13, 16  ;;  %v4674_v7 = vld [vmem:[%s6176_s5 + $0x160] sm:$0xff]  ;;  %v2569_v8 = vshrl.u32 %v5812_v13, 16 }
 0x24d   : > { %2832 = vmatpush.bf16.msra.mxu1 %v4658_v48  ;;  %4843 = vmatpush.bf16.msra.mxu3 %v4658_v48  ;;  %v5823_v21 = vpack.c.b16 %v2549_v9, %v2549_v9  ;;  %v4635_v22 = vld [vmem:[%s6176_s5 + $0x28] sm:$0xff]  ;;  %v4634_v27 = vld [vmem:[%s6176_s5 + $0x20] sm:$0xff]  ;;  %v4673_v28 = vld [vmem:[%s6176_s5 + $0x158] sm:$0xff]  ;;  %p5008_p2 = pnand %p5007_p1, %p5003_p12 }
 0x24e   : > { %2861 = vmatpush.bf16.msra.mxu2 %v4666_v49  ;;  %v4643_v43 = vld [vmem:[%s6176_s5 + $0x68] sm:$0xff]  ;;  %v2573_v33 = vrot.slane %v2571_v19, 1  ;;  %v4642_v50 = vld [vmem:[%s6176_s5 + $0x60] sm:$0xff]  ;;  %v4633_v31 = vld [vmem:[%s6176_s5 + $0x18] sm:$0xff] }
 0x24f   : > { %3476 = vmatpush.bf16.msrb.mxu0 %v4682_v12  ;;  %v2576_v23 = vshll.u32 %v5823_v21, 16  ;;  %v2514_v34 = vld [vmem:[#allocation3 + $0x2c] sm:$0x1]  ;;  %v4641_v30 = vld [vmem:[%s6176_s5 + $0x58] sm:$0xff]  ;;  %v5854_v18 = vld [vmem:[#allocation3 + $0x30] sm:$0xff]   ;;  %v2581_v12 = vshrl.u32 %v5772_v58, 16 }
 0x250   : > { %v5843_v39 = vor.u32 %v2573_v33, %v2569_v8  ;;  %v4672_v37 = vld [vmem:[%s6176_s5 + $0x150] sm:$0xff]  ;;  %v2550_v36 = vunpack.c.l.b16 %v2514_v34  ;;  %v4967_v38 = vld [vmem:[#allocation3 + $0xc] sm:$0xe]  ;;  %v5861_v40 = vld [vmem:[#allocation3 + $0x24] sm:$0xff]   ;;  %v2595_v0 = vshll.u32 %v5854_v18, 16  ;;  %v2624_v33 = vrot.slane %v5823_v21, 1 }
 0x251   : > { %2833 = vmatpush.bf16.msra.mxu1 %v4657_v2  ;;  %4844 = vmatpush.bf16.msra.mxu3 %v4657_v2  ;;  %v2578_v51 = vrot.slane %v2576_v23, 1  ;;  %v5863_v44 = vld [vmem:[#allocation3 + $0x24] sm:$0xf0]  ;;  %v4640_v42 = vld [vmem:[%s6176_s5 + $0x50] sm:$0xff]  ;;  %v4670_v16 = vld [vmem:[%s6176_s5 + $0x140] sm:$0xff] }
 0x252   : > { %2862 = vmatpush.bf16.msra.mxu2 %v4665_v55  ;;  %v4671_v48 = vld [vmem:[%s6176_s5 + $0x148] sm:$0xff]  ;;  %v5876_v49 = vpack.c.b16 %v2550_v36, %v2550_v36  ;;  %v4968_v55 = vor.u32 %v4967_v38, %v5734_v41  ;;  %v4630_v35 = vld [vmem:[%s6176_s5] sm:$0xff]  ;;  %v4653_v41 = vld [vmem:[%s6176_s5 + $0xb8] sm:$0xff] }
 0x253   : > { %3477 = vmatpush.bf16.msrb.mxu0 %v4681_v56  ;;  %v2579_v57 = vsel %vm627_vm0, %v5843_v39, %v2578_v51  ;;  %v4631_v53 = vld [vmem:[%s6176_s5 + $0x8] sm:$0xff]  ;;  %v4693_v56 = vld [vmem:[%s6176_s5 + $0x1f8] sm:$0xff]  ;;  %v4650_v9 = vld [vmem:[%s6176_s5 + $0xa0] sm:$0xff] }
 0x254   : > { %v4639_v2 = vld [vmem:[%s6176_s5 + $0x48] sm:$0xff]  ;;  %v2515_v62 = vld [vmem:[#allocation3 + $0x38] sm:$0x1]  ;;  %v4690_v19 = vld [vmem:[%s6176_s5 + $0x1e0] sm:$0xff] }
 0x255   : > { %2834 = vmatpush.bf16.msra.mxu1 %v4656_v17  ;;  %4845 = vmatpush.bf16.msra.mxu3 %v4656_v17  ;;  %v2585_v17 = vrot.slane %v2583_v47, 1  ;;  %v2551_v59 = vunpack.c.l.b16 %v2515_v62  ;;  %v4699_v23 = vld [vmem:[%s6176_s5 + $0x228] sm:$0xff]  ;;  %v4970_v34 = vld [vmem:[#allocation3 + $0x24] sm:$0xe]  ;;  %v4689_v36 = vld [vmem:[%s6176_s5 + $0x1d8] sm:$0xff] }
 0x256   : > { %2863 = vmatpush.bf16.msra.mxu2 %v4664_v20  ;;  %v2588_v20 = vshll.u32 %v5876_v49, 16  ;;  %v2331_v51 = vld [vmem:[#allocation3 + $0x8] sm:$0x1]  ;;  %v4697_v38 = vld [vmem:[%s6176_s5 + $0x218] sm:$0xff]  ;;  %v4688_v47 = vld [vmem:[%s6176_s5 + $0x1d0] sm:$0xff] }
 0x257   : > { %3478 = vmatpush.bf16.msrb.mxu0 %v4680_v29  ;;  %v2586_v61 = vor.u32 %v2585_v17, %v2581_v12  ;;  %v4652_v29 = vld [vmem:[%s6176_s5 + $0xb0] sm:$0xff]  ;;  %v4647_v17 = vld [vmem:[%s6176_s5 + $0x88] sm:$0xff] }
 0x258   : > { %v2590_v25 = vrot.slane %v2588_v20, 1  ;;  %v3156_v20 = vld [vmem:[#allocation3 + $0x20] sm:$0x1] }
 0x259   : > { %2835 = vmatpush.bf16.msra.mxu1 %v4655_v24  ;;  %4846 = vmatpush.bf16.msra.mxu3 %v4655_v24  ;;  %v4638_v24 = vld [vmem:[%s6176_s5 + $0x40] sm:$0xff]  ;;  %v3192_v62 = vunpack.c.l.b16 %v3156_v20  ;;  %v4973_v20 = vld [vmem:[#allocation3 + $0xc] sm:$0xe] }
 0x25a   : > { %2864 = vmatpush.bf16.msra.mxu2 %v4663_v11  ;;  %v2621_v11 = vrot.slane %v5763_v1, 1  ;;  %v4692_v1 = vld [vmem:[%s6176_s5 + $0x1f0] sm:$0xff]  ;;  %v2591_v5 = vsel %vm627_vm0, %v2586_v61, %v2590_v25  ;;  %v4686_v61 = vld [vmem:[%s6176_s5 + $0x1c0] sm:$0xff] }
 0x25b   : > { %3479 = vmatpush.bf16.msrb.mxu0 %v4679_v4  ;;  %v5926_v4 = vpack.c.b16 %v2551_v59, %v2551_v59  ;;  %v2332_v25 = vld [vmem:[#allocation3 + $0x14] sm:$0x1] }
 0x25d   : > { %2836 = vmatpush.bf16.msra.mxu1 %v4654_v63  ;;  %4847 = vmatpush.bf16.msra.mxu3 %v4654_v63 }
 0x25e   : > { %2865 = vmatpush.bf16.msra.mxu2 %v4662_v45  ;;  %v5909_v45 = vld [vmem:[#allocation3] sm:$0xff]  }
 0x25f   : > { %3480 = vmatpush.bf16.msrb.mxu0 %v4678_v52  ;;  %v5933_v52 = vld [vmem:[#allocation3 + $0xc] sm:$0xf0] }
 0x260   : > { %2837 = vmatmul.bf16.vlgmr.msra.gmra.mxu1 %v5732_v32  ;;  %2847 = vmatmul.bf16.vlgmr.msra.gmra.mxu3 %v5772_v58  ;;  %v4632_v32 = vld [vmem:[%s6176_s5 + $0x10] sm:$0xff]  ;;  %v2620_v58 = vrot.slane %v4968_v55, 1  ;;  %v2376_v55 = vshrl.u32 %v5909_v45, 16 }
 0x261   : > { %2887 = vmatpush.bf16.msrb.mxu3 %v4677_v46  ;;  %3060 = vmatpush.bf16.msrb.mxu1 %v4637_v14  ;;  %v4651_v46 = vld [vmem:[%s6176_s5 + $0xa8] sm:$0xff] }
 0x262   : > { %3089 = vmatpush.bf16.msrb.mxu2 %v4645_v3  ;;  %3481 = vmatmul.bf16.vlgmr.msrb.gmra.mxu0 %v5812_v13  ;;  %v2622_v63 = vsel %vm724_vm1, %v2620_v58, %v2621_v11  ;;  %v4701_v3 = vld [vmem:[%s6176_s5 + $0x238] sm:$0xff]  ;;  %v4691_v14 = vld [vmem:[%s6176_s5 + $0x1e8] sm:$0xff]  ;;  %v4646_v11 = vld [vmem:[%s6176_s5 + $0x80] sm:$0xff] }
 0x263   : > { %2866 = vmatmul.bf16.vlgmr.msra.gmra.mxu2 %v2567_v6  ;;  %v4827_v6 = vld [vmem:[#allocation3 + $0x18] sm:$0xf0]  ;;  %3531 = vmatpush.bf16.msra.mxu0 %v4701_v3 }
 0x265   : > { %2888 = vmatpush.bf16.msrb.mxu3 %v4676_v26  ;;  %3061 = vmatpush.bf16.msrb.mxu1 %v4636_v54  ;;  %v4828_v26 = vld [vmem:[#allocation3 + $0x18] sm:$0xe] }
 0x266   : > { %3090 = vmatpush.bf16.msrb.mxu2 %v4644_v10  ;;  %v4829_v54 = vor.u32 %v4828_v26, %v4827_v6  ;;  %v5931_v10 = vld [vmem:[#allocation3 + $0xc] sm:$0xff]  }
 0x267   : > { %v4831_v6 = vld [vmem:[#allocation3 + $0x30] sm:$0xe] }
 0x268   : > { %v2623_v8 = vrot.slane %v4829_v54, 1 }
 0x269   : > { %2889 = vmatpush.bf16.msrb.mxu3 %v4675_v15  ;;  %3062 = vmatpush.bf16.msrb.mxu1 %v4635_v22  ;;  %v4700_v15 = vld [vmem:[%s6176_s5 + $0x230] sm:$0xff]  ;;  %v2593_v22 = vshrl.u32 %v5854_v18, 16 }
 0x26a   : > { %3091 = vmatpush.bf16.msrb.mxu2 %v4643_v43  ;;  %v2597_v43 = vrot.slane %v2595_v0, 1  ;;  %3532 = vmatpush.bf16.msra.mxu0 %v4700_v15  ;;  %v4830_v0 = vld [vmem:[#allocation3 + $0x30] sm:$0xf0] }
 0x26b   : > { %v4832_v54 = vor.u32 %v4831_v6, %v4830_v0  ;;  %v4822_v6 = vld [vmem:[#allocation3 + $0x18] sm:$0xf0] }
 0x26d   : > { %2890 = vmatpush.bf16.msrb.mxu3 %v4674_v7  ;;  %3063 = vmatpush.bf16.msrb.mxu1 %v4634_v27  ;;  %v2600_v7 = vshll.u32 %v5926_v4, 16  ;;  %v5948_v27 = vor.u32 %v2597_v43, %v2593_v22  ;;  %v2388_v43 = vshrl.u32 %v5931_v10, 16 }
 0x26e   : > { %3092 = vmatpush.bf16.msrb.mxu2 %v4642_v50  ;;  %3533 = vmatpush.bf16.msra.mxu0 %v4699_v23 }
 0x26f   : > { %v2602_v50 = vrot.slane %v2600_v7, 1 }
 0x270   : > { %2842 = vmatmul.bf16.gmra.mxu1 %v5812_v13  ;;  %2852 = vmatmul.bf16.gmra.mxu3 %v5854_v18 }
 0x271   : > { %2891 = vmatpush.bf16.msrb.mxu3 %v4673_v28  ;;  %3064 = vmatpush.bf16.msrb.mxu1 %v4633_v31  ;;  %v2625_v28 = vsel %vm724_vm1, %v2623_v8, %v2624_v33  ;;  %v4698_v31 = vld [vmem:[%s6176_s5 + $0x220] sm:$0xff]  ;;  %v2603_v21 = vsel %vm627_vm0, %v5948_v27, %v2602_v50  ;;  %v2630_v33 = vrot.slane %v5926_v4, 1 }
 0x272   : > { %3093 = vmatpush.bf16.msrb.mxu2 %v4641_v30  ;;  %3486 = vmatmul.bf16.gmra.mxu0 %v5861_v40  ;;  %v2367_v30 = vunpack.c.l.b16 %v2331_v51  ;;  %v2333_v51 = vld [vmem:[#allocation3 + $0x20] sm:$0x1] }
 0x273   : > { %2871 = vmatmul.bf16.gmra.mxu2 %v2579_v57  ;;  %v5958_v57 = vld [vmem:[#allocation3 + $0x3c] sm:$0xf0]  ;;  %3534 = vmatpush.bf16.msra.mxu0 %v4698_v31 }
 0x275   : > { %2892 = vmatpush.bf16.msrb.mxu3 %v4672_v37  ;;  %3065 = vmatpush.bf16.msrb.mxu1 %v4632_v32  ;;  %v4649_v37 = vld [vmem:[%s6176_s5 + $0x98] sm:$0xff]  ;;  %v2378_v32 = vshll.u32 %v5909_v45, 16 }
 0x276   : > { %3094 = vmatpush.bf16.msrb.mxu2 %v4640_v42  ;;  %v5971_v42 = vpack.c.b16 %v2367_v30, %v2367_v30  ;;  %v4819_v30 = vld [vmem:[#allocation3] sm:$0xf0] }
 0x277   : > { %3535 = vmatpush.bf16.msra.mxu0 %v4697_v38 }
 0x278   : > { %v2383_v12 = vshll.u32 %v5971_v42, 16  ;;  %v2440_v4 = vrot.slane %v5971_v42, 1  ;;  %v3215_v42 = vshll.u32 %v5861_v40, 16 }
 0x279   : > { %2893 = vmatpush.bf16.msrb.mxu3 %v4671_v48  ;;  %3066 = vmatpush.bf16.msrb.mxu1 %v4631_v53  ;;  %v4648_v48 = vld [vmem:[%s6176_s5 + $0x90] sm:$0xff]  ;;  %v4971_v53 = vor.u32 %v4970_v34, %v5774_v60  ;;  %v4687_v60 = vld [vmem:[%s6176_s5 + $0x1c8] sm:$0xff] }
 0x27a   : > { %3095 = vmatpush.bf16.msrb.mxu2 %v4639_v2  ;;  %v4696_v2 = vld [vmem:[%s6176_s5 + $0x210] sm:$0xff]  ;;  %v2385_v58 = vrot.slane %v2383_v12, 1 }
 0x27b   : > { %3536 = vmatpush.bf16.msra.mxu0 %v4696_v2 }
 0x27d   : > { %2894 = vmatpush.bf16.msrb.mxu3 %v4670_v16  ;;  %3067 = vmatpush.bf16.msrb.mxu1 %v4630_v35  ;;  %v2380_v16 = vrot.slane %v2378_v32, 1  ;;  %v2626_v35 = vrot.slane %v4971_v53, 1  ;;  %v3157_v53 = vld [vmem:[#allocation3 + $0x2c] sm:$0x1] }
 0x27e   : > { %3096 = vmatpush.bf16.msrb.mxu2 %v4638_v24  ;;  %v3193_v12 = vunpack.c.l.b16 %v3157_v53 }
 0x27f   : > { %v2381_v24 = vor.u32 %v2380_v16, %v2376_v55 }
 0x280   : > { %2895 = vmatmul.bf16.vlgmr.msrb.gmra.mxu3 %v2622_v63  ;;  %3068 = vmatmul.bf16.vlgmr.msrb.gmra.mxu1 %v5909_v45  ;;  %v4834_v63 = vld [vmem:[#allocation3 + $0x18] sm:$0xf0]  ;;  %v4835_v45 = vld [vmem:[#allocation3 + $0x18] sm:$0xe] }
 0x281   : > { %3118 = vmatpush.bf16.msra.mxu3 %v4653_v41  ;;  %3502 = vmatpush.bf16.msra.mxu1 %v4693_v56  ;;  %v2627_v41 = vrot.slane %v5876_v49, 1  ;;  %v4695_v56 = vld [vmem:[%s6176_s5 + $0x208] sm:$0xff]  ;;  %v4836_v59 = vor.u32 %v4835_v45, %v4834_v63 }
 0x282   : > { %4848 = vmatpush.bf16.msra.mxu2 %v4701_v3  ;;  %3491 = vmatmul.bf16.gmra.mxu0 %v5854_v18  ;;  %v5956_v18 = vld [vmem:[#allocation3 + $0x3c] sm:$0xff]  }
 0x283   : > { %2876 = vmatmul.bf16.gmra.mxu2 %v2591_v5  ;;  %v2628_v49 = vsel %vm724_vm1, %v2626_v35, %v2627_v41  ;;  %3537 = vmatpush.bf16.msra.mxu0 %v4695_v56  ;;  %v2368_v5 = vunpack.c.l.b16 %v2332_v25  ;;  %v3264_v3 = vrot.slane %v4836_v59, 1  ;;  %v3197_v35 = vpack.c.b16 %v3193_v12, %v3193_v12  ;;  %v3158_v59 = vld [vmem:[#allocation3 + $0x38] sm:$0x1] }
 0x285   : > { %3119 = vmatpush.bf16.msra.mxu3 %v4652_v29  ;;  %3503 = vmatpush.bf16.msra.mxu1 %v4692_v1  ;;  %v4694_v29 = vld [vmem:[%s6176_s5 + $0x200] sm:$0xff]  ;;  %v2386_v1 = vsel %vm627_vm0, %v2381_v24, %v2385_v58  ;;  %v2372_v26 = vpack.c.b16 %v2368_v5, %v2368_v5  ;;  %v4974_v24 = vor.u32 %v4973_v20, %v5933_v52  ;;  %v3213_v58 = vshrl.u32 %v5861_v40, 16 }
 0x286   : > { %4849 = vmatpush.bf16.msra.mxu2 %v4700_v15  ;;  %v2329_v15 = vld [vmem:[#allocation3 + $0x24] sm:$0xff]   ;;  %v3194_v52 = vunpack.c.l.b16 %v3158_v59 }
 0x287   : > { %3538 = vmatpush.bf16.msra.mxu0 %v4694_v29  ;;  %v2395_v8 = vshll.u32 %v2372_v26, 16  ;;  %v2412_v25 = vshrl.u32 %v2329_v15, 16 }
 0x288   : > { %v3198_v0 = vpack.c.b16 %v3194_v52, %v3194_v52 }
 0x289   : > { %3120 = vmatpush.bf16.msra.mxu3 %v4651_v46  ;;  %3504 = vmatpush.bf16.msra.mxu1 %v4691_v14  ;;  %v3196_v46 = vpack.c.b16 %v3192_v62, %v3192_v62  ;;  %v2397_v50 = vrot.slane %v2395_v8, 1 }
 0x28a   : > { %4850 = vmatpush.bf16.msra.mxu2 %v4699_v23 }
 0x28b   : > { %v3265_v14 = vrot.slane %v3196_v46, 1 }
 0x28d   : > { %3121 = vmatpush.bf16.msra.mxu3 %v4650_v9  ;;  %3505 = vmatpush.bf16.msra.mxu1 %v4690_v19  ;;  %v2390_v9 = vshll.u32 %v5931_v10, 16  ;;  %v6009_v19 = vld [vmem:[#allocation3 + $0x24] sm:$0xf0]  ;;  %v3266_v22 = vsel %vm724_vm1, %v3264_v3, %v3265_v14  ;;  %v4976_v14 = vld [vmem:[#allocation3 + $0x24] sm:$0xe] }
 0x28e   : > { %4851 = vmatpush.bf16.msra.mxu2 %v4698_v31 }
 0x28f   : > { %v2392_v7 = vrot.slane %v2390_v9, 1  ;;  %v4823_v9 = vld [vmem:[#allocation3 + $0x18] sm:$0xe] }
 0x290   : > { %2900 = vmatmul.bf16.gmra.mxu3 %v2625_v28  ;;  %3073 = vmatmul.bf16.gmra.mxu1 %v5931_v10  ;;  %v4820_v10 = vld [vmem:[#allocation3] sm:$0xe] }
 0x291   : > { %3122 = vmatpush.bf16.msra.mxu3 %v4649_v37  ;;  %3506 = vmatpush.bf16.msra.mxu1 %v4689_v36  ;;  %v2393_v23 = vor.u32 %v2392_v7, %v2388_v43  ;;  %v4821_v37 = vor.u32 %v4820_v10, %v4819_v30  ;;  %v3208_v36 = vshll.u32 %v3196_v46, 16  ;;  %v4837_v10 = vld [vmem:[#allocation3 + $0x30] sm:$0xf0] }
 0x292   : > { %4852 = vmatpush.bf16.msra.mxu2 %v4697_v38  ;;  %3496 = vmatmul.bf16.gmra.mxu0 %v5956_v18 }
 0x293   : > { %2881 = vmatmul.bf16.gmra.mxu2 %v2603_v21  ;;  %v2398_v31 = vsel %vm627_vm0, %v2393_v23, %v2397_v50  ;;  %v2369_v21 = vunpack.c.l.b16 %v2333_v51  ;;  %v2439_v32 = vrot.slane %v4821_v37, 1  ;;  %v4838_v37 = vld [vmem:[#allocation3 + $0x30] sm:$0xe] }
 0x294   : > { %v4839_v53 = vor.u32 %v4838_v37, %v4837_v10 }
 0x295   : > { %3123 = vmatpush.bf16.msra.mxu3 %v4648_v48  ;;  %3507 = vmatpush.bf16.msra.mxu1 %v4688_v47  ;;  %v2373_v34 = vpack.c.b16 %v2369_v21, %v2369_v21  ;;  %v3210_v48 = vrot.slane %v3208_v36, 1  ;;  %v2441_v55 = vsel %vm724_vm1, %v2439_v32, %v2440_v4 }
 0x296   : > { %4853 = vmatpush.bf16.msra.mxu2 %v4696_v2  ;;  %v2334_v2 = vld [vmem:[#allocation3 + $0x2c] sm:$0x1] }
 0x297   : > { %v2407_v38 = vshll.u32 %v2373_v34, 16  ;;  %v3211_v16 = vsel %vm627_vm0, %v5843_v39, %v3210_v48  ;;  %v2446_v43 = vrot.slane %v2373_v34, 1  ;;  %v3239_v34 = vshll.u32 %v5956_v18, 16 }
 0x299   : > { %3124 = vmatpush.bf16.msra.mxu3 %v4647_v17  ;;  %3508 = vmatpush.bf16.msra.mxu1 %v4687_v60  ;;  %v2409_v47 = vrot.slane %v2407_v38, 1  ;;  %v2370_v60 = vunpack.c.l.b16 %v2334_v2  ;;  %v3241_v48 = vrot.slane %v3239_v34, 1 }
 0x29a   : > { %4854 = vmatpush.bf16.msra.mxu2 %v4695_v56  ;;  %v2414_v56 = vshll.u32 %v2329_v15, 16 }
 0x29b   : > { %v2410_v17 = vsel %vm627_vm0, %v5843_v39, %v2409_v47  ;;  %v6023_v41 = vpack.c.b16 %v2370_v60, %v2370_v60  ;;  %v3271_v60 = vrot.slane %v3198_v0, 1 }
 0x29c   : > { %v2416_v62 = vrot.slane %v2414_v56, 1 }
 0x29d   : > { %3125 = vmatpush.bf16.msra.mxu3 %v4646_v11  ;;  %3509 = vmatpush.bf16.msra.mxu1 %v4686_v61  ;;  %v3217_v11 = vrot.slane %v3215_v42, 1  ;;  %v3220_v61 = vshll.u32 %v3197_v35, 16  ;;  %v2419_v39 = vshll.u32 %v6023_v41, 16 }
 0x29e   : > { %4855 = vmatpush.bf16.msra.mxu2 %v4694_v29  ;;  %v2443_v29 = vrot.slane %v2372_v26, 1  ;;  %v4824_v26 = vor.u32 %v4823_v9, %v4822_v6 }
 0x29f   : > { %v3218_v63 = vor.u32 %v3217_v11, %v3213_v58  ;;  %v3222_v45 = vrot.slane %v3220_v61, 1  ;;  %v2421_v5 = vrot.slane %v2419_v39, 1  ;;  %v4982_v11 = vld [vmem:[#allocation3 + $0x3c] sm:$0xe] }
 0x2a0   : > { %2905 = vmatmul.bf16.gmra.mxu3 %v2628_v49  ;;  %3078 = vmatmul.bf16.gmra.mxu1 %v5812_v13  ;;  %v2629_v13 = vrot.slane %v4832_v54, 1  ;;  %v2442_v49 = vrot.slane %v4974_v24, 1  ;;  %v3232_v54 = vshll.u32 %v3198_v0, 16  ;;  %v4983_v39 = vor.u32 %v4982_v11, %v5958_v57 }
 0x2a1   : > { %v3223_v3 = vsel %vm627_vm0, %v3218_v63, %v3222_v45 }
 0x2a2   : > { %3539 = vmatmul.bf16.vlgmr.msra.gmra.mxu0 %v3266_v22  ;;  %v2631_v28 = vsel %vm724_vm1, %v2629_v13, %v2630_v33  ;;  %v2444_v46 = vsel %vm724_vm1, %v2442_v49, %v2443_v29  ;;  %v2445_v22 = vrot.slane %v4824_v26, 1  ;;  %v3234_v7 = vrot.slane %v3232_v54, 1  ;;  %v3159_v33 = vld [vmem:[#allocation3 + $0x44] sm:$0x1] }
 0x2a3   : > { %3097 = vmatmul.bf16.vlgmr.msrb.gmra.mxu2 %v2386_v1  ;;  %v2417_v1 = vor.u32 %v2416_v62, %v2412_v25  ;;  %v3268_v13 = vrot.slane %v3197_v35, 1  ;;  %v3273_v29 = vrot.slane %v4983_v39, 1 }
 0x2a4   : > { %v2447_v50 = vsel %vm724_vm1, %v2445_v22, %v2446_v43  ;;  %v3235_v51 = vsel %vm627_vm0, %v5948_v27, %v3234_v7  ;;  %v3237_v27 = vshrl.u32 %v5956_v18, 16 }
 0x2a5   : > { %v2422_v40 = vsel %vm627_vm0, %v2417_v1, %v2421_v5 }
 0x2b0   : > { %2910 = vmatmul.bf16.gmra.mxu3 %v2631_v28  ;;  %3083 = vmatmul.bf16.gmra.mxu1 %v2329_v15  ;;  %v4977_v15 = vor.u32 %v4976_v14, %v5863_v44  ;;  %v4979_v28 = vld [vmem:[#allocation3 + $0x24] sm:$0xe] }
 0x2b1   : > { %v4980_v38 = vor.u32 %v4979_v28, %v6009_v19 }
 0x2b2   : > { %v3267_v8 = vrot.slane %v4977_v15, 1 }
 0x2b3   : > { %3102 = vmatmul.bf16.gmra.mxu2 %v2398_v31  ;;  %v3195_v31 = vunpack.c.l.b16 %v3159_v33  ;;  %v2448_v2 = vrot.slane %v4980_v38, 1 }
 0x2b4   : > { %v3269_v21 = vsel %vm724_vm1, %v3267_v8, %v3268_v13 }
 0x2b5   : > { %v3199_v44 = vpack.c.b16 %v3195_v31, %v3195_v31 }
 0x2b7   : > { %v3244_v47 = vshll.u32 %v3199_v44, 16  ;;  %v3274_v63 = vrot.slane %v3199_v44, 1 }
 0x2b9   : > { %v3246_v12 = vrot.slane %v3244_v47, 1 }
 0x2c0   : > { %3126 = vmatmul.bf16.vlgmr.msra.gmra.mxu3 %v2441_v55  ;;  %3510 = vmatmul.bf16.vlgmr.msra.gmra.mxu1 %v3211_v16  ;;  %v2449_v55 = vrot.slane %v6023_v41, 1  ;;  %v3242_v16 = vor.u32 %v3241_v48, %v3237_v27 }
 0x2c2   : > { %v2450_v56 = vsel %vm724_vm1, %v2448_v2, %v2449_v55  ;;  %v3247_v24 = vsel %vm627_vm0, %v3242_v16, %v3246_v12 }
 0x2c3   : > { %3107 = vmatmul.bf16.gmra.mxu2 %v2410_v17  ;;  %v3270_v17 = vrot.slane %v4839_v53, 1 }
 0x2c5   : > { %v3272_v18 = vsel %vm724_vm1, %v3270_v17, %v3271_v60 }
 0x2d0   : > { %3131 = vmatmul.bf16.gmra.mxu3 %v2444_v46  ;;  %3515 = vmatmul.bf16.gmra.mxu1 %v3223_v3  ;;  %v3275_v46 = vsel %vm724_vm1, %v3273_v29, %v3274_v63 }
 0x2d3   : > { %3112 = vmatmul.bf16.gmra.mxu2 %v2422_v40 }
 0x2dd   : > { %v2838_v23 = vpop.f32.mrf.mxu1 }
 0x2df   : > { %v6047_v58 = vpop.f32.mrf.mxu0 }
 0x2e0   : > { %3136 = vmatmul.bf16.gmra.mxu3 %v2447_v50  ;;  %3520 = vmatmul.bf16.gmra.mxu1 %v3235_v51 }
 0x2e3   : > { %3544 = vmatmul.bf16.vlgmr.msra.gmra.mxu2 %v3269_v21  ;;  %v2848_v30 = vpop.f32.mrf.mxu3 }
 0x2e5   : > { %v2840_v4 = vpop.f32.mrf.mxu1 }
 0x2e6   : > { %v2867_v36 = vpop.f32.mrf.mxu2 }
 0x2e7   : > { %v6038_v32 = vadd.f32 %v2867_v36, %v2838_v23  ;;  %v6050_v49 = vpop.f32.mrf.mxu0 }
 0x2eb   : > { %v2850_v20 = vpop.f32.mrf.mxu3 }
 0x2ed   : > { %v2843_v19 = vpop.f32.mrf.mxu1 }
 0x2ee   : > { %v2869_v35 = vpop.f32.mrf.mxu2 }
 0x2ef   : > { %v6042_v42 = vadd.f32 %v2869_v35, %v2840_v4  ;;  %v6053_v52 = vpop.f32.mrf.mxu0 }
 0x2f0   : > { %3141 = vmatmul.bf16.gmra.mxu3 %v2450_v56  ;;  %3525 = vmatmul.bf16.gmra.mxu1 %v3247_v24 }
 0x2f3   : > { %3549 = vmatmul.bf16.gmra.mxu2 %v3272_v18  ;;  %v2853_v41 = vpop.f32.mrf.mxu3 }
 0x2f5   : > { %v2845_v62 = vpop.f32.mrf.mxu1 }
 0x2f6   : > { %v2872_v61 = vpop.f32.mrf.mxu2 }
 0x2f7   : > { %v2873_v25 = vadd.f32 %v2872_v61, %v2843_v19  ;;  %v6055_v54 = vpop.f32.mrf.mxu0 }
 0x2fb   : > { %v2855_v45 = vpop.f32.mrf.mxu3 }
 0x2fd   : > { %v3069_v59 = vpop.f32.mrf.mxu1 }
 0x2fe   : > { %v2874_v1 = vpop.f32.mrf.mxu2 }
 0x2ff   : > { %v2875_v5 = vadd.f32 %v2874_v1, %v2845_v62  ;;  %v6059_v33 = vpop.f32.mrf.mxu0 }
 0x303   : > { %3554 = vmatmul.bf16.gmra.mxu2 %v3275_v46  ;;  %v2896_v3 = vpop.f32.mrf.mxu3 }
 0x304   : > { %v2897_v35 = vadd.f32 %v2896_v3, %v6038_v32  ;;  %v6083_v32 = vld [vmem:[%s6177_s6] ss:$0 sm:$0xff] }
 0x305   : > { %v3071_v0 = vpop.f32.mrf.mxu1 }
 0x306   : > { %v2877_v40 = vpop.f32.mrf.mxu2  ;;  %v3070_v61 = vadd.f32 %v3069_v59, %v2897_v35  ;;  %v3583_v35 = vld [vmem:[%s5212_s20 + $0x21] sm:$0xff] }
 0x307   : > { %v2878_v14 = vadd.f32 %v2877_v40, %v2848_v30  ;;  %v6063_v44 = vpop.f32.mrf.mxu0 }
 0x30b   : > { %v2898_v6 = vpop.f32.mrf.mxu3 }
 0x30c   : > { %v2899_v29 = vadd.f32 %v2898_v6, %v6042_v42 }
 0x30d   : > { %v3074_v26 = vpop.f32.mrf.mxu1 }
 0x30e   : > { %v2879_v9 = vpop.f32.mrf.mxu2  ;;  %v3072_v46 = vadd.f32 %v3071_v0, %v2899_v29 }
 0x30f   : > { %v2880_v57 = vadd.f32 %v2879_v9, %v2850_v20  ;;  %v6067_v4 = vpop.f32.mrf.mxu0 }
 0x313   : > { %v2901_v15 = vpop.f32.mrf.mxu3 }
 0x314   : > { %v2902_v43 = vadd.f32 %v2901_v15, %v2873_v25 }
 0x315   : > { %v3076_v8 = vpop.f32.mrf.mxu1 }
 0x316   : > { %v2882_v22 = vpop.f32.mrf.mxu2  ;;  %v6057_v13 = vadd.f32 %v3074_v26, %v2902_v43 }
 0x317   : > { %v2883_v7 = vadd.f32 %v2882_v22, %v2853_v41  ;;  %v6071_v17 = vpop.f32.mrf.mxu0  ;;  %v3581_v22 = vld [vmem:[%s5212_s20 + $0x9] sm:$0xff] }
 0x31b   : > { %v2903_v23 = vpop.f32.mrf.mxu3 }
 0x31c   : > { %v2904_v51 = vadd.f32 %v2903_v23, %v2875_v5  ;;  %v3580_v5 = vld [vmem:[%s5212_s20 + $0x1] sm:$0xff] }
 0x31d   : > { %v3079_v31 = vpop.f32.mrf.mxu1 }
 0x31e   : > { %v2884_v50 = vpop.f32.mrf.mxu2  ;;  %v6061_v21 = vadd.f32 %v3076_v8, %v2904_v51 }
 0x31f   : > { %v2885_v28 = vadd.f32 %v2884_v50, %v2855_v45  ;;  %v3540_v41 = vpop.f32.mrf.mxu0 }
 0x323   : > { %v2906_v34 = vpop.f32.mrf.mxu3 }
 0x324   : > { %v2907_v30 = vadd.f32 %v2906_v34, %v2878_v14 }
 0x325   : > { %v3081_v37 = vpop.f32.mrf.mxu1 }
 0x326   : > { %v3098_v10 = vpop.f32.mrf.mxu2  ;;  %v6065_v36 = vadd.f32 %v3079_v31, %v2907_v30 }
 0x327   : > { %v3099_v25 = vadd.f32 %v3098_v10, %v3070_v61  ;;  %v3542_v40 = vpop.f32.mrf.mxu0 }
 0x32b   : > { %v2908_v38 = vpop.f32.mrf.mxu3 }
 0x32c   : > { %v2909_v27 = vadd.f32 %v2908_v38, %v2880_v57  ;;  %v3582_v38 = vld [vmem:[%s5212_s20 + $0x19] sm:$0xff] }
 0x32d   : > { %v3084_v47 = vpop.f32.mrf.mxu1 }
 0x32e   : > { %v3100_v48 = vpop.f32.mrf.mxu2  ;;  %v6069_v53 = vadd.f32 %v3081_v37, %v2909_v27 }
 0x32f   : > { %v3101_v14 = vadd.f32 %v3100_v48, %v3072_v46 }
 0x333   : > { %v2911_v2 = vpop.f32.mrf.mxu3 }
 0x334   : > { %v2912_v55 = vadd.f32 %v2911_v2, %v2883_v7 }
 0x335   : > { %v3086_v12 = vpop.f32.mrf.mxu1 }
 0x336   : > { %v3103_v16 = vpop.f32.mrf.mxu2  ;;  %v6073_v60 = vadd.f32 %v3084_v47, %v2912_v55 }
 0x33b   : > { %v2913_v20 = vpop.f32.mrf.mxu3 }
 0x33c   : > { %v2914_v19 = vadd.f32 %v2913_v20, %v2885_v28  ;;  %v3104_v28 = vadd.f32 %v3103_v16, %v6057_v13 }
 0x33d   : > { %v3511_v24 = vpop.f32.mrf.mxu1 }
 0x33e   : > { %v3105_v56 = vpop.f32.mrf.mxu2  ;;  %v3512_v18 = vadd.f32 %v3511_v24, %v6047_v58  ;;  %v6077_v11 = vadd.f32 %v3086_v12, %v2914_v19 }
 0x33f   : > { %v3106_v47 = vadd.f32 %v3105_v56, %v6061_v21 }
 0x340   : > { %v3541_v62 = vadd.f32 %v3540_v41, %v3512_v18 }
 0x343   : > { %v3127_v39 = vpop.f32.mrf.mxu3 }
 0x344   : > { %v3128_v45 = vadd.f32 %v3127_v39, %v3099_v25  ;;  %v3584_v39 = vld [vmem:[%s5212_s20 + $0x31] sm:$0xff] }
 0x345   : > { %v3513_v1 = vpop.f32.mrf.mxu1 }
 0x346   : > { %v3108_v63 = vpop.f32.mrf.mxu2  ;;  %v3560_v58 = vadd.f32 %v3541_v62, %v3128_v45  ;;  %v3514_v3 = vadd.f32 %v3513_v1, %v6050_v49 }
 0x347   : > { %v3109_v24 = vadd.f32 %v3108_v63, %v6065_v36 }
 0x348   : > { %v3572_v59 = vadd.f32 %v6083_v32, %v3560_v58  ;;  %v3543_v9 = vadd.f32 %v3542_v40, %v3514_v3  ;;  %v3585_v3 = vld [vmem:[%s5212_s20 + $0x39] sm:$0xff] }
 0x34a   : > { %v3588_v42 = vadd.f32 %v3580_v5, %v3572_v59 }
 0x34b   : > { %v3129_v6 = vpop.f32.mrf.mxu3 }
 0x34c   : > { %3596 = vst [vmem:[%s5237_s11] sm:$0xff] %v3588_v42  ;;  %v3130_v26 = vadd.f32 %v3129_v6, %v3101_v14 }
 0x34d   : > { %v3516_v8 = vpop.f32.mrf.mxu1 }
 0x34e   : > { %v3110_v57 = vpop.f32.mrf.mxu2  ;;  %v3561_v15 = vadd.f32 %v3543_v9, %v3130_v26  ;;  %v3517_v31 = vadd.f32 %v3516_v8, %v6053_v52 }
 0x34f   : > { %v3111_v45 = vadd.f32 %v3110_v57, %v6069_v53 }
 0x350   : > { %v3573_v43 = vadd.f32 %v6083_v32, %v3561_v15  ;;  %v3586_v15 = vld [vmem:[%s5212_s20 + $0x49] sm:$0xff] }
 0x352   : > { %v3589_v7 = vadd.f32 %v3581_v22, %v3573_v43 }
 0x353   : > { %v3132_v23 = vpop.f32.mrf.mxu3 }
 0x354   : > { %3597 = vst [vmem:[%s5237_s11 + $0x8] sm:$0xff] %v3589_v7  ;;  %v3133_v30 = vadd.f32 %v3132_v23, %v3104_v28 }
 0x355   : > { %v3518_v49 = vpop.f32.mrf.mxu1 }
 0x356   : > { %v3113_v0 = vpop.f32.mrf.mxu2  ;;  %v3519_v2 = vadd.f32 %v3518_v49, %v6055_v54 }
 0x357   : > { %v3114_v14 = vadd.f32 %v3113_v0, %v6073_v60 }
 0x35b   : > { %v3134_v51 = vpop.f32.mrf.mxu3 }
 0x35c   : > { %v3135_v13 = vadd.f32 %v3134_v51, %v3106_v47  ;;  %v3587_v51 = vld [vmem:[%s5212_s20 + $0x51] sm:$0xff] }
 0x35d   : > { %v3521_v48 = vpop.f32.mrf.mxu1 }
 0x35e   : > { %v6092_v50 = vpop.f32.mrf.mxu2  ;;  %v3522_v18 = vadd.f32 %v3521_v48, %v6059_v33 }
 0x363   : > { %v3137_v12 = vpop.f32.mrf.mxu3 }
 0x364   : > { %v3138_v41 = vadd.f32 %v3137_v12, %v3109_v24 }
 0x365   : > { %v3523_v56 = vpop.f32.mrf.mxu1 }
 0x366   : > { %v3545_v34 = vpop.f32.mrf.mxu2  ;;  %v3524_v36 = vadd.f32 %v3523_v56, %v6063_v44 }
 0x367   : > { %v3546_v10 = vadd.f32 %v3545_v34, %v3517_v31 }
 0x369   : > { %v3562_v37 = vadd.f32 %v3546_v10, %v3133_v30 }
 0x36b   : > { %v3574_v27 = vadd.f32 %v6083_v32, %v3562_v37  ;;  %v3139_v25 = vpop.f32.mrf.mxu3 }
 0x36c   : > { %v3140_v1 = vadd.f32 %v3139_v25, %v3111_v45 }
 0x36d   : > { %v3590_v55 = vadd.f32 %v3582_v38, %v3574_v27  ;;  %v3526_v5 = vpop.f32.mrf.mxu1 }
 0x36e   : > { %v3547_v20 = vpop.f32.mrf.mxu2  ;;  %v3527_v53 = vadd.f32 %v3526_v5, %v6067_v4  ;;  %v3116_v4 = vadd.f32 %v6092_v50, %v6077_v11 }
 0x36f   : > { %3598 = vst [vmem:[%s5237_s11 + $0x10] sm:$0xff] %v3590_v55  ;;  %v3548_v52 = vadd.f32 %v3547_v20, %v3519_v2 }
 0x371   : > { %v3563_v16 = vadd.f32 %v3548_v52, %v3135_v13 }
 0x373   : > { %v3575_v19 = vadd.f32 %v6083_v32, %v3563_v16  ;;  %v3142_v59 = vpop.f32.mrf.mxu3 }
 0x374   : > { %v3143_v6 = vadd.f32 %v3142_v59, %v3114_v14 }
 0x375   : > { %v3591_v21 = vadd.f32 %v3583_v35, %v3575_v19  ;;  %v3528_v26 = vpop.f32.mrf.mxu1 }
 0x376   : > { %v3550_v54 = vpop.f32.mrf.mxu2  ;;  %v3529_v43 = vadd.f32 %v3528_v26, %v6071_v17 }
 0x377   : > { %3599 = vst [vmem:[%s5237_s11 + $0x18] sm:$0xff] %v3591_v21  ;;  %v3551_v61 = vadd.f32 %v3550_v54, %v3522_v18 }
 0x379   : > { %v3564_v62 = vadd.f32 %v3551_v61, %v3138_v41 }
 0x37b   : > { %v3576_v29 = vadd.f32 %v6083_v32, %v3564_v62  ;;  %v3144_v60 = vpop.f32.mrf.mxu3 }
 0x37c   : > { %v3145_v8 = vadd.f32 %v3144_v60, %v3116_v4 }
 0x37d   : > { %v3592_v33 = vadd.f32 %v3584_v39, %v3576_v29 }
 0x37e   : > { %v3552_v63 = vpop.f32.mrf.mxu2 }
 0x37f   : > { %3600 = vst [vmem:[%s5237_s11 + $0x20] sm:$0xff] %v3592_v33  ;;  %v3553_v58 = vadd.f32 %v3552_v63, %v3524_v36 }
 0x381   : > { %v3565_v46 = vadd.f32 %v3553_v58, %v3140_v1 }
 0x383   : > { %v3577_v40 = vadd.f32 %v6083_v32, %v3565_v46 }
 0x385   : > { %v3593_v42 = vadd.f32 %v3585_v3, %v3577_v40 }
 0x386   : > { %v3555_v44 = vpop.f32.mrf.mxu2 }
 0x387   : > { %3601 = vst [vmem:[%s5237_s11 + $0x28] sm:$0xff] %v3593_v42  ;;  %v3556_v9 = vadd.f32 %v3555_v44, %v3527_v53 }
 0x389   : > { %v3566_v57 = vadd.f32 %v3556_v9, %v3143_v6 }
 0x38b   : > { %v3578_v22 = vadd.f32 %v6083_v32, %v3566_v57 }
 0x38d   : > { %v3594_v7 = vadd.f32 %v3586_v15, %v3578_v22 }
 0x38e   : > { %v3557_v0 = vpop.f32.mrf.mxu2 }
 0x38f   : > { %3602 = vst [vmem:[%s5237_s11 + $0x30] sm:$0xff] %v3594_v7  ;;  %v3558_v23 = vadd.f32 %v3557_v0, %v3529_v43 }
 0x391   : > { %v3567_v49 = vadd.f32 %v3558_v23, %v3145_v8 }
 0x393   : > { %v3579_v11 = vadd.f32 %v6083_v32, %v3567_v49 }
 0x395   : > { %v3595_v17 = vadd.f32 %v3587_v51, %v3579_v11 }
 0x397   : > { %3603 = vst [vmem:[%s5237_s11 + $0x38] sm:$0xff] %v3595_v17 }
 0x398   : > { %5011 = shalt.err (!%p5008_p2)
}
 0x399   : > { %s5084_s11 = smov 128   ;;  %s5085_s30 = smov 8  }
 0x39a   : > { %4860 = dma.vmem_to_hbm [thread:$0]  (%p5177_p3), %s3621_s22, 1024, %s3623_s9, %s3605_s21, %s5084_s11, %s5084_s11, %s5085_s30  }
 0x39b PF: > { %p4866_p4 = scmp.ge.s32.totalorder %s5078_s8, 2  ;;  %s3637_s0 = sand.u32 1, %s5050_s24  }
 0x39c   : > { %s3638_s29 = scalar_lea.sflag [#allocation5], %s3637_s0 }
 0x39d   : > { %p4863_p5 = pnand %p4866_p4, %p5186_p8 }
 0x39f   : > { %p4864_p6 = pneg %p4863_p5 }
 0x3a1   : > { %5045 = dma.done.wait (%p4864_p6), %s3638_s29, 1024  }
 0x3a2   : > { %5047 = vsyncadd (%p4864_p6), %s3638_s29, 4294966272  ;;  %s20_s8 = sadd.s32 1, %s5078_s8   ;;  %s6196_s27 = sld [smem:[#allocation11_spill]] }
 0x3a3   : > { %p17_p7 = scmp.ge.s32.totalorder %s20_s8, 10   ;;  %s6197_s14 = sld [smem:[#allocation7_spill]] }
 0x3a4   : > { %s6198_s28 = sld [smem:[#allocation8_spill]]  ;;  %s6201_s24 = smov %s5054_s25 }
 0x3a5   : > { %s6199_s29 = sld [smem:[#allocation9_spill]]  ;;  %s6202_s25 = smov %s5058_s26 }
 0x3a6   : > { %s6200_s30 = sld [smem:[#allocation10_spill]]  ;;  %19 = sbr.rel (!%p17_p7) target bundleno = 7 (0x7), region = 124 }
 0x3a8   : > { %s6203_s26 = smov %s6196_s27 }
 0x3a9   : > { %s6204_s27 = smov %s6197_s14 }
 0x3ab   :  { %3644 = vsyncpa [#allocation5], 1 }
 0x3ac   :  { %3646 = vsyncpa [#allocation5 + $0x1], 1 }

</bundles_post_ra>
